<compile_context>
chip_gen: v6e
topology: v6e:2x2x1
jax: 0.10.0
libtpu: 0.0.40
codegen_flags: <defaults>
</compile_context>

<pallas_src>
import functools

import jax
import jax.numpy as jnp
from jax.experimental import pallas as pl
from jax.experimental.pallas import tpu as pltpu

LANE = 128


def _round_up(x, m):
    return (x + m - 1) // m * m


def _pad2(x, rows, cols):
    return jnp.pad(x, ((0, rows - x.shape[0]), (0, cols - x.shape[1])))


def _vmem_budget_bytes():
    """Generation-aware VMEM budget usable for kernel tiles (bytes)."""
    cap = 64 * 1024 * 1024  # conservative default = v7x per-core VMEM
    try:
        info = pltpu.get_tpu_info()
        cap = int(getattr(info, "vmem_capacity_bytes", cap)) or cap
    except Exception:
        pass
    # ~25% headroom for Mosaic-internal scratch, pipeline bookkeeping, spills.
    return int(cap * 0.75)


def _divisor_tiles(n, cap, step=LANE):
    """Multiples of `step` dividing n, descending, capped at `cap`."""
    out = [t for t in range(step, min(n, cap) + 1, step) if n % t == 0]
    return out[::-1] if out else [n]


def _select_sage_tiles(n_pad, c_pad, h_pad, x_bytes, a_bytes, w_bytes, o_bytes,
                       budget):
    """Pick (tm, tk) maximizing the streamed A/X tiles within the VMEM budget."""
    # NOTE: resident weights are still double-buffered by the default pipeline
    # (pl.Buffered(1) single-buffering skipped for portability); accounted below.
    for tm in _divisor_tiles(n_pad, 512):
        fixed = (2 * 2 * c_pad * h_pad * w_bytes      # W_l, W_r (double-buffered)
                 + 2 * h_pad * 4                      # b_l
                 + 2 * tm * c_pad * x_bytes           # x row tile (self term)
                 + 2 * tm * h_pad * o_bytes           # output tile
                 + tm * c_pad * 4 + tm * h_pad * 4)   # f32 accumulators
        for tk in _divisor_tiles(n_pad, 8192):
            per = 2 * tk * c_pad * x_bytes + 2 * tm * tk * a_bytes
            if fixed + per <= budget:
                return tm, tk
    return LANE, LANE


def _select_mlp_tile(p_pad, h_pad, x_bytes, budget):
    fixed = 2 * 2 * h_pad * h_pad * x_bytes + 2 * 3 * h_pad * 4 + 2 * LANE * 4
    for tp in _divisor_tiles(p_pad, 1024):
        per = 2 * 2 * tp * h_pad * x_bytes + 2 * tp * LANE * 4
        if fixed + per <= budget:
            return tp
    return LANE


# --------------------------------------------------------------------------
# SAGE layer kernel:  out = act( (A @ X) @ W_l + b_l + X @ W_r )
# grid = (row_tiles [parallel], src_tiles [arbitrary, reduction])
# --------------------------------------------------------------------------
def _sage_layer_kernel(x_k_ref, a_ref, x_i_ref, wl_ref, bl_ref, wr_ref,
                       out_ref, agg_acc, self_acc, *, apply_relu):
    k = pl.program_id(1)

    @pl.when(k == 0)
    def _():
        agg_acc[...] = jnp.zeros_like(agg_acc)
        # Self-term computed up front (balances per-step MXU work so the
        # finalize step is not an exposed three-matmul burst).
        self_acc[...] = jnp.dot(x_i_ref[...], wr_ref[...],
                                preferred_element_type=jnp.float32)

    # Mean-aggregation A @ X accumulated over source-node tiles (f32 acc).
    # A may be stored in bf16 (HBM-bound stream); upcast on the VPU is free-ish.
    agg_acc[...] += jnp.dot(a_ref[...].astype(x_k_ref.dtype), x_k_ref[...],
                            preferred_element_type=jnp.float32)

    @pl.when(k == pl.num_programs(1) - 1)
    def _():
        agg = agg_acc[...].astype(wl_ref.dtype)
        h = (jnp.dot(agg, wl_ref[...], preferred_element_type=jnp.float32)
             + bl_ref[...]
             + self_acc[...])
        if apply_relu:
            h = jnp.maximum(h, 0.0)
        # NOTE: padded rows end up as act(b_l); harmless because A's padded
        # columns are zero and edge_pairs only index real rows.
        out_ref[...] = h.astype(out_ref.dtype)


def _sage_layer(x, a, wl, bl, wr, *, apply_relu, out_dtype, vmem_budget):
    n_pad = a.shape[0]
    c = x.shape[1]
    h = wl.shape[1]
    x_bytes = jnp.dtype(x.dtype).itemsize
    a_bytes = jnp.dtype(a.dtype).itemsize
    w_bytes = jnp.dtype(wl.dtype).itemsize
    o_bytes = jnp.dtype(out_dtype).itemsize
    tm, tk = _select_sage_tiles(n_pad, c, h, x_bytes, a_bytes, w_bytes, o_bytes,
                                int(vmem_budget * 0.9))
    grid = (n_pad // tm, n_pad // tk)

    kernel = functools.partial(_sage_layer_kernel, apply_relu=apply_relu)
    return pl.pallas_call(
        kernel,
        out_shape=jax.ShapeDtypeStruct((n_pad, h), out_dtype),
        grid_spec=pltpu.PrefetchScalarGridSpec(
            num_scalar_prefetch=0,
            grid=grid,
            in_specs=[
                pl.BlockSpec((tk, c), lambda i, k: (k, 0)),   # X, k-tile (A@X)
                pl.BlockSpec((tm, tk), lambda i, k: (i, k)),  # A tile
                pl.BlockSpec((tm, c), lambda i, k: (i, 0)),   # X, row tile (self)
                pl.BlockSpec((c, h), lambda i, k: (0, 0)),    # W_l (resident)
                pl.BlockSpec((1, h), lambda i, k: (0, 0)),    # b_l (resident)
                pl.BlockSpec((c, h), lambda i, k: (0, 0)),    # W_r (resident)
            ],
            out_specs=pl.BlockSpec((tm, h), lambda i, k: (i, 0)),
            scratch_shapes=[pltpu.VMEM((tm, c), jnp.float32),   # A@X accumulator
                            pltpu.VMEM((tm, h), jnp.float32)],  # self-term
        ),
        compiler_params=pltpu.CompilerParams(
            dimension_semantics=("parallel", "arbitrary"),
            vmem_limit_bytes=vmem_budget,
        ),
    )(x, a, x, wl, bl, wr)


# --------------------------------------------------------------------------
# Link-prediction MLP kernel over pair tiles:
#   z = relu(h_src @ W1s + h_dst @ W1d + b1)
#   prob = sigmoid(sum(z * w2_row, -1) + b2)   (1-wide linear as VPU/XLU reduce)
# Output is a lane-dense (tp, 128) slab (prob broadcast across lanes).
# --------------------------------------------------------------------------
def _link_mlp_kernel(hs_ref, hd_ref, w1s_ref, w1d_ref, b1_ref, w2_ref, b2_ref,
                     out_ref):
    z = (jnp.dot(hs_ref[...], w1s_ref[...], preferred_element_type=jnp.float32)
         + jnp.dot(hd_ref[...], w1d_ref[...], preferred_element_type=jnp.float32)
         + b1_ref[...])
    z = jnp.maximum(z, 0.0)
    logit = jnp.sum(z * w2_ref[...], axis=-1, keepdims=True)      # (tp, 1)
    out_ref[...] = jax.nn.sigmoid(logit + b2_ref[...])            # (tp, 128)


def _link_mlp(hs, hd, w1s, w1d, b1, w2_row, b2_row, *, vmem_budget):
    p_pad, h = hs.shape
    tp = _select_mlp_tile(p_pad, h, jnp.dtype(hs.dtype).itemsize,
                          int(vmem_budget * 0.9))
    grid = (p_pad // tp,)
    return pl.pallas_call(
        _link_mlp_kernel,
        out_shape=jax.ShapeDtypeStruct((p_pad, LANE), jnp.float32),
        grid_spec=pltpu.PrefetchScalarGridSpec(
            num_scalar_prefetch=0,
            grid=grid,
            in_specs=[
                pl.BlockSpec((tp, h), lambda i: (i, 0)),     # h_src tile
                pl.BlockSpec((tp, h), lambda i: (i, 0)),     # h_dst tile
                pl.BlockSpec((h, h), lambda i: (0, 0)),      # W1 src half
                pl.BlockSpec((h, h), lambda i: (0, 0)),      # W1 dst half
                pl.BlockSpec((1, h), lambda i: (0, 0)),      # b1
                pl.BlockSpec((1, h), lambda i: (0, 0)),      # w2 row
                pl.BlockSpec((1, LANE), lambda i: (0, 0)),   # b2 (lane-broadcast)
            ],
            out_specs=pl.BlockSpec((tp, LANE), lambda i: (i, 0)),
        ),
        compiler_params=pltpu.CompilerParams(
            dimension_semantics=("parallel",),
            vmem_limit_bytes=vmem_budget,
        ),
    )(hs, hd, w1s, w1d, b1, w2_row, b2_row)


# --------------------------------------------------------------------------
# Wrapper (jitted: adjacency build + pads/casts + gathers fuse with kernels)
# --------------------------------------------------------------------------
def build_mean_adj(edge_index, num_nodes):
    """Dense mean-aggregation matrix: A[i, j] = 1/deg_in(i) if edge j -> i."""
    src, dst = edge_index[0], edge_index[1]
    adj = jnp.zeros((num_nodes, num_nodes), jnp.float32).at[dst, src].add(1.0)
    deg = adj.sum(axis=1, keepdims=True)
    return jnp.where(deg > 0, adj / jnp.maximum(deg, 1.0), 0.0)


@functools.partial(jax.jit, static_argnames=("compute_dtype", "a_dtype"))
def graphsage_link_predictor(x, edge_index, edge_pairs, params,
                             compute_dtype=jnp.float32,
                             a_dtype=jnp.bfloat16):
    n, c_in = x.shape
    hidden = params["w1l"].shape[1]
    p = edge_pairs.shape[1]

    n_pad = _round_up(n, LANE)
    c_pad = _round_up(c_in, LANE)
    h_pad = _round_up(hidden, LANE)

    vmem_budget = _vmem_budget_bytes()

    # Dense normalized adjacency (scatter-mean as a matmul), zero-padded.
    # A carries the dominant N^2 HBM stream -> bf16 by default.
    a = _pad2(build_mean_adj(edge_index, n), n_pad, n_pad).astype(a_dtype)
    xp = _pad2(x, n_pad, c_pad).astype(compute_dtype)

    w1l = _pad2(params["w1l"], c_pad, h_pad).astype(compute_dtype)
    b1l = _pad2(params["b1l"], 1, h_pad).astype(jnp.float32)
    w1r = _pad2(params["w1r"], c_pad, h_pad).astype(compute_dtype)
    w2l = _pad2(params["w2l"], h_pad, h_pad).astype(compute_dtype)
    b2l = _pad2(params["b2l"], 1, h_pad).astype(jnp.float32)
    w2r = _pad2(params["w2r"], h_pad, h_pad).astype(compute_dtype)

    # ---- two SAGE layers (tiled, pipelined) ----
    h1 = _sage_layer(xp, a, w1l, b1l, w1r, apply_relu=True,
                     out_dtype=compute_dtype, vmem_budget=vmem_budget)
    h2 = _sage_layer(h1, a, w2l, b2l, w2r, apply_relu=False,
                     out_dtype=compute_dtype, vmem_budget=vmem_budget)

    # ---- edge-endpoint gather (O(P*H) XLA gather, fused under jit) ----
    hs = h2[edge_pairs[0]]
    hd = h2[edge_pairs[1]]
    p_pad = _round_up(max(p, 1), LANE)
    hs = jnp.pad(hs, ((0, p_pad - p), (0, 0)))
    hd = jnp.pad(hd, ((0, p_pad - p), (0, 0)))

    # Split the first link-pred linear so no concat is needed inside the kernel.
    wp1s = _pad2(params["wp1"][:hidden, :], h_pad, h_pad).astype(compute_dtype)
    wp1d = _pad2(params["wp1"][hidden:, :], h_pad, h_pad).astype(compute_dtype)
    bp1 = _pad2(params["bp1"], 1, h_pad).astype(jnp.float32)
    wp2_row = _pad2(params["wp2"].T, 1, h_pad).astype(jnp.float32)
    bp2_row = jnp.broadcast_to(params["bp2"].reshape(1, 1),
                               (1, LANE)).astype(jnp.float32)

    probs = _link_mlp(hs, hd, wp1s, wp1d, bp1, wp2_row, bp2_row,
                      vmem_budget=vmem_budget)
    return probs[:p, 0]  # matches torch .squeeze()


# --------------------------------------------------------------------------
# Pure-JAX reference mirroring the PyTorch module semantics.
# --------------------------------------------------------------------------
def reference_forward(x, edge_index, edge_pairs, params):
    a = build_mean_adj(edge_index, x.shape[0])
    h = jax.nn.relu((a @ x) @ params["w1l"] + params["b1l"] + x @ params["w1r"])
    h = (a @ h) @ params["w2l"] + params["b2l"] + h @ params["w2r"]
    hs = h[edge_pairs[0]]
    hd = h[edge_pairs[1]]
    z = jax.nn.relu(jnp.concatenate([hs, hd], axis=1) @ params["wp1"] + params["bp1"])
    return jnp.squeeze(jax.nn.sigmoid(z @ params["wp2"] + params["bp2"]))


def init_params(key, in_channels, hidden_channels):
    ks = jax.random.split(key, 10)
    s = 0.1
    return {
        # SAGEConv 1 (lin_l with bias, lin_r without)
        "w1l": s * jax.random.normal(ks[0], (in_channels, hidden_channels), jnp.float32),
        "b1l": s * jax.random.normal(ks[1], (1, hidden_channels), jnp.float32),
        "w1r": s * jax.random.normal(ks[2], (in_channels, hidden_channels), jnp.float32),
        # SAGEConv 2
        "w2l": s * jax.random.normal(ks[3], (hidden_channels, hidden_channels), jnp.float32),
        "b2l": s * jax.random.normal(ks[4], (1, hidden_channels), jnp.float32),
        "w2r": s * jax.random.normal(ks[5], (hidden_channels, hidden_channels), jnp.float32),
        # link_pred MLP: Linear(2H, H) -> ReLU -> Linear(H, 1)
        "wp1": s * jax.random.normal(ks[6], (2 * hidden_channels, hidden_channels), jnp.float32),
        "bp1": s * jax.random.normal(ks[7], (1, hidden_channels), jnp.float32),
        "wp2": s * jax.random.normal(ks[8], (hidden_channels, 1), jnp.float32),
        "bp2": s * jax.random.normal(ks[9], (1, 1), jnp.float32),
    }


if __name__ == "__main__":
    key = jax.random.PRNGKey(0)
    k_x, k_e, k_p, k_w = jax.random.split(key, 4)

    num_nodes = 16
    in_channels = 8
    hidden_channels = 32
    num_edges = 40
    num_pairs = 6

    x = jax.random.normal(k_x, (num_nodes, in_channels), jnp.float32)
    edge_index = jax.random.randint(k_e, (2, num_edges), 0, num_nodes, jnp.int32)
    edge_pairs = jax.random.randint(k_p, (2, num_pairs), 0, num_nodes, jnp.int32)
    params = init_params(k_w, in_channels, hidden_channels)

    ref = reference_forward(x, edge_index, edge_pairs, params)

    # strict f32 path (f32 A too): must match the reference tightly
    out_f32 = graphsage_link_predictor(x, edge_index, edge_pairs, params,
                                       compute_dtype=jnp.float32,
                                       a_dtype=jnp.float32)
    out_f32 = jax.block_until_ready(out_f32)
    assert out_f32.shape == (num_pairs,)
    assert jnp.allclose(out_f32, ref, atol=1e-5), (out_f32, ref)

    # default path: f32 compute with bf16 adjacency stream (HBM-bound stream)
    out_def = graphsage_link_predictor(x, edge_index, edge_pairs, params)
    out_def = jax.block_until_ready(out_def)
    assert out_def.shape == (num_pairs,)
    assert bool(jnp.all(jnp.isfinite(out_def)))
    assert jnp.allclose(out_def, ref, atol=3e-2), (out_def, ref)

    # full bf16 throughput mode: looser tolerance
    out_bf16 = graphsage_link_predictor(x, edge_index, edge_pairs, params,
                                        compute_dtype=jnp.bfloat16,
                                        a_dtype=jnp.bfloat16)
    out_bf16 = jax.block_until_ready(out_bf16)
    assert out_bf16.shape == (num_pairs,)
    assert bool(jnp.all(jnp.isfinite(out_bf16)))
    assert jnp.allclose(out_bf16, ref, atol=1e-1), (out_bf16, ref)

    print("KERNEL_OK")
</pallas_src>

<mosaic_0001>
module attributes {stable_mosaic.version = 11 : i64} {
  func.func private @main(%arg0: i32) attributes {dimension_semantics = [#tpu.dimension_semantics<core_parallel>], iteration_bounds = array<i64: 2>, tpu.core_type = #tpu.core_type<sc_scalar_subcore>, window_params = []} {
    return
  }
}

module attributes {stable_mosaic.version = 11 : i64} {
  func.func private @main(%arg0: i32) attributes {dimension_semantics = [#tpu.dimension_semantics<core_parallel>], iteration_bounds = array<i64: 2>, tpu.core_type = #tpu.core_type<sc_scalar_subcore>, window_params = []} {
    return
  }
}

module attributes {stable_mosaic.version = 11 : i64} {
  func.func @_link_mlp_kernel(%arg0: i32, %arg1: memref<128x128xf32, #tpu.memory_space<vmem>>, %arg2: memref<128x128xf32, #tpu.memory_space<vmem>>, %arg3: memref<128x128xf32, #tpu.memory_space<vmem>>, %arg4: memref<128x128xf32, #tpu.memory_space<vmem>>, %arg5: memref<1x128xf32, #tpu.memory_space<vmem>>, %arg6: memref<1x128xf32, #tpu.memory_space<vmem>>, %arg7: memref<1x128xf32, #tpu.memory_space<vmem>>, %arg8: memref<128x128xf32, #tpu.memory_space<vmem>>) attributes {dimension_semantics = [#tpu.dimension_semantics<parallel>], iteration_bounds = array<i64: 1>, scalar_prefetch = 0 : i64, scratch_operands = 0 : i64, tpu.core_type = #tpu.core_type<tc>, window_params = [{transform_indices = @transform_0, window_bounds = array<i64: 128, 128>}, {transform_indices = @transform_1, window_bounds = array<i64: 128, 128>}, {pipeline_mode = #tpu.pipeline_mode<synchronous>, transform_indices = @transform_2, window_bounds = array<i64: 128, 128>}, {pipeline_mode = #tpu.pipeline_mode<synchronous>, transform_indices = @transform_3, window_bounds = array<i64: 128, 128>}, {pipeline_mode = #tpu.pipeline_mode<synchronous>, transform_indices = @transform_4, window_bounds = array<i64: 1, 128>}, {pipeline_mode = #tpu.pipeline_mode<synchronous>, transform_indices = @transform_5, window_bounds = array<i64: 1, 128>}, {pipeline_mode = #tpu.pipeline_mode<synchronous>, transform_indices = @transform_6, window_bounds = array<i64: 1, 128>}, {transform_indices = @transform_7, window_bounds = array<i64: 128, 128>}]} {
    %c0 = arith.constant 0 : index
    %c0_0 = arith.constant 0 : index
    %0 = vector.load %arg1[%c0, %c0_0] : memref<128x128xf32, #tpu.memory_space<vmem>>, vector<128x128xf32>
    %c0_1 = arith.constant 0 : index
    %c0_2 = arith.constant 0 : index
    %1 = vector.load %arg3[%c0_1, %c0_2] : memref<128x128xf32, #tpu.memory_space<vmem>>, vector<128x128xf32>
    %cst = arith.constant dense<0.000000e+00> : vector<128x128xf32>
    %2 = tpu.matmul %0, %1, %cst {dimension_numbers = #tpu.dot_dimension_numbers<[1], [0], [0], [1], [0, 0, 1, 1], [], []>} : vector<128x128xf32>, vector<128x128xf32>, vector<128x128xf32> -> vector<128x128xf32>
    %c0_3 = arith.constant 0 : index
    %c0_4 = arith.constant 0 : index
    %3 = vector.load %arg2[%c0_3, %c0_4] : memref<128x128xf32, #tpu.memory_space<vmem>>, vector<128x128xf32>
    %c0_5 = arith.constant 0 : index
    %c0_6 = arith.constant 0 : index
    %4 = vector.load %arg4[%c0_5, %c0_6] : memref<128x128xf32, #tpu.memory_space<vmem>>, vector<128x128xf32>
    %cst_7 = arith.constant dense<0.000000e+00> : vector<128x128xf32>
    %5 = tpu.matmul %3, %4, %cst_7 {dimension_numbers = #tpu.dot_dimension_numbers<[1], [0], [0], [1], [0, 0, 1, 1], [], []>} : vector<128x128xf32>, vector<128x128xf32>, vector<128x128xf32> -> vector<128x128xf32>
    %6 = arith.addf %2, %5 : vector<128x128xf32>
    %c0_8 = arith.constant 0 : index
    %c0_9 = arith.constant 0 : index
    %7 = vector.load %arg5[%c0_8, %c0_9] : memref<1x128xf32, #tpu.memory_space<vmem>>, vector<1x128xf32>
    %8 = vector.broadcast %7 : vector<1x128xf32> to vector<128x128xf32>
    %9 = arith.addf %6, %8 : vector<128x128xf32>
    %cst_10 = arith.constant 0.000000e+00 : f32
    %10 = vector.broadcast %cst_10 : f32 to vector<128x128xf32>
    %11 = arith.maximumf %9, %10 : vector<128x128xf32>
    %c0_11 = arith.constant 0 : index
    %c0_12 = arith.constant 0 : index
    %12 = vector.load %arg6[%c0_11, %c0_12] : memref<1x128xf32, #tpu.memory_space<vmem>>, vector<1x128xf32>
    %13 = vector.broadcast %12 : vector<1x128xf32> to vector<128x128xf32>
    %14 = arith.mulf %11, %13 : vector<128x128xf32>
    %cst_13 = arith.constant dense<0.000000e+00> : vector<128xf32>
    %15 = vector.multi_reduction <add>, %14, %cst_13 [1] : vector<128x128xf32> to vector<128xf32>
    %16 = vector.shape_cast %15 : vector<128xf32> to vector<128x1xf32>
    %c0_14 = arith.constant 0 : index
    %c0_15 = arith.constant 0 : index
    %17 = vector.load %arg7[%c0_14, %c0_15] : memref<1x128xf32, #tpu.memory_space<vmem>>, vector<1x128xf32>
    %18 = vector.broadcast %16 : vector<128x1xf32> to vector<128x128xf32>
    %19 = vector.broadcast %17 : vector<1x128xf32> to vector<128x128xf32>
    %20 = arith.addf %18, %19 : vector<128x128xf32>
    %21 = arith.negf %20 : vector<128x128xf32>
    %22 = math.exp %21 : vector<128x128xf32>
    %cst_16 = arith.constant 1.000000e+00 : f32
    %23 = vector.broadcast %cst_16 : f32 to vector<128x128xf32>
    %24 = arith.addf %23, %22 : vector<128x128xf32>
    %25 = arith.divf %23, %24 : vector<128x128xf32>
    %c0_17 = arith.constant 0 : index
    %c0_18 = arith.constant 0 : index
    %26 = vector.load %arg8[%c0_17, %c0_18] : memref<128x128xf32, #tpu.memory_space<vmem>>, vector<128x128xf32>
    tpu.vector_store %arg8[%c0_17, %c0_18], %25 {strides = array<i32>} : memref<128x128xf32, #tpu.memory_space<vmem>>, vector<128x128xf32>,
    return
  }
  func.func @transform_0(%arg0: i32) -> (i32, i32) {
    %c0_i32 = arith.constant 0 : i32
    %c0_i32_0 = arith.constant 0 : i32
    return %arg0, %c0_i32 : i32, i32
  }
  func.func @transform_1(%arg0: i32) -> (i32, i32) {
    %c0_i32 = arith.constant 0 : i32
    %c0_i32_0 = arith.constant 0 : i32
    return %arg0, %c0_i32 : i32, i32
  }
  func.func @transform_2(%arg0: i32) -> (i32, i32) {
    %c0_i32 = arith.constant 0 : i32
    %c0_i32_0 = arith.constant 0 : i32
    %c0_i32_1 = arith.constant 0 : i32
    return %c0_i32, %c0_i32_0 : i32, i32
  }
  func.func @transform_3(%arg0: i32) -> (i32, i32) {
    %c0_i32 = arith.constant 0 : i32
    %c0_i32_0 = arith.constant 0 : i32
    %c0_i32_1 = arith.constant 0 : i32
    return %c0_i32, %c0_i32_0 : i32, i32
  }
  func.func @transform_4(%arg0: i32) -> (i32, i32) {
    %c0_i32 = arith.constant 0 : i32
    %c0_i32_0 = arith.constant 0 : i32
    %c0_i32_1 = arith.constant 0 : i32
    return %c0_i32, %c0_i32_0 : i32, i32
  }
  func.func @transform_5(%arg0: i32) -> (i32, i32) {
    %c0_i32 = arith.constant 0 : i32
    %c0_i32_0 = arith.constant 0 : i32
    %c0_i32_1 = arith.constant 0 : i32
    return %c0_i32, %c0_i32_0 : i32, i32
  }
  func.func @transform_6(%arg0: i32) -> (i32, i32) {
    %c0_i32 = arith.constant 0 : i32
    %c0_i32_0 = arith.constant 0 : i32
    %c0_i32_1 = arith.constant 0 : i32
    return %c0_i32, %c0_i32_0 : i32, i32
  }
  func.func @transform_7(%arg0: i32) -> (i32, i32) {
    %c0_i32 = arith.constant 0 : i32
    %c0_i32_0 = arith.constant 0 : i32
    return %arg0, %c0_i32 : i32, i32
  }
}

module attributes {stable_mosaic.version = 11 : i64} {
  func.func @_sage_layer_kernel(%arg0: i32, %arg1: i32, %arg2: memref<128x128xf32, #tpu.memory_space<vmem>>, %arg3: memref<128x128xf32, #tpu.memory_space<vmem>>, %arg4: memref<128x128xf32, #tpu.memory_space<vmem>>, %arg5: memref<128x128xf32, #tpu.memory_space<vmem>>, %arg6: memref<1x128xf32, #tpu.memory_space<vmem>>, %arg7: memref<128x128xf32, #tpu.memory_space<vmem>>, %arg8: memref<128x128xf32, #tpu.memory_space<vmem>>, %arg9: memref<128x128xf32, #tpu.memory_space<vmem>>, %arg10: memref<128x128xf32, #tpu.memory_space<vmem>>) attributes {dimension_semantics = [#tpu.dimension_semantics<parallel>, #tpu.dimension_semantics<arbitrary>], iteration_bounds = array<i64: 1, 1>, scalar_prefetch = 0 : i64, scratch_operands = 2 : i64, tpu.core_type = #tpu.core_type<tc>, window_params = [{transform_indices = @transform_0, window_bounds = array<i64: 128, 128>}, {transform_indices = @transform_1, window_bounds = array<i64: 128, 128>}, {transform_indices = @transform_2, window_bounds = array<i64: 128, 128>}, {pipeline_mode = #tpu.pipeline_mode<synchronous>, transform_indices = @transform_3, window_bounds = array<i64: 128, 128>}, {pipeline_mode = #tpu.pipeline_mode<synchronous>, transform_indices = @transform_4, window_bounds = array<i64: 1, 128>}, {pipeline_mode = #tpu.pipeline_mode<synchronous>, transform_indices = @transform_5, window_bounds = array<i64: 128, 128>}, {transform_indices = @transform_6, window_bounds = array<i64: 128, 128>}]} {
    %c0_i32 = arith.constant 0 : i32
    %0 = arith.cmpi eq, %arg1, %c0_i32 : i32
    %1 = arith.extui %0 : i1 to i32
    %c0_i32_0 = arith.constant 0 : i32
    %2 = arith.cmpi ne, %1, %c0_i32_0 : i32
    scf.if %2 {
      %cst_10 = arith.constant 0.000000e+00 : f32
      %12 = vector.broadcast %cst_10 : f32 to vector<128x128xf32>
      %c0_11 = arith.constant 0 : index
      %c0_12 = arith.constant 0 : index
      %13 = vector.load %arg9[%c0_11, %c0_12] : memref<128x128xf32, #tpu.memory_space<vmem>>, vector<128x128xf32>
      tpu.vector_store %arg9[%c0_11, %c0_12], %12 {strides = array<i32>} : memref<128x128xf32, #tpu.memory_space<vmem>>, vector<128x128xf32>,
      %c0_13 = arith.constant 0 : index
      %c0_14 = arith.constant 0 : index
      %14 = vector.load %arg4[%c0_13, %c0_14] : memref<128x128xf32, #tpu.memory_space<vmem>>, vector<128x128xf32>
      %c0_15 = arith.constant 0 : index
      %c0_16 = arith.constant 0 : index
      %15 = vector.load %arg7[%c0_15, %c0_16] : memref<128x128xf32, #tpu.memory_space<vmem>>, vector<128x128xf32>
      %cst_17 = arith.constant dense<0.000000e+00> : vector<128x128xf32>
      %16 = tpu.matmul %14, %15, %cst_17 {dimension_numbers = #tpu.dot_dimension_numbers<[1], [0], [0], [1], [0, 0, 1, 1], [], []>} : vector<128x128xf32>, vector<128x128xf32>, vector<128x128xf32> -> vector<128x128xf32>
      %c0_18 = arith.constant 0 : index
      %c0_19 = arith.constant 0 : index
      %17 = vector.load %arg10[%c0_18, %c0_19] : memref<128x128xf32, #tpu.memory_space<vmem>>, vector<128x128xf32>
      tpu.vector_store %arg10[%c0_18, %c0_19], %16 {strides = array<i32>} : memref<128x128xf32, #tpu.memory_space<vmem>>, vector<128x128xf32>,
    } else {
    }
    %c0 = arith.constant 0 : index
    %c0_1 = arith.constant 0 : index
    %3 = vector.load %arg9[%c0, %c0_1] : memref<128x128xf32, #tpu.memory_space<vmem>>, vector<128x128xf32>
    %c0_2 = arith.constant 0 : index
    %c0_3 = arith.constant 0 : index
    %4 = vector.load %arg3[%c0_2, %c0_3] : memref<128x128xf32, #tpu.memory_space<vmem>>, vector<128x128xf32>
    %c0_4 = arith.constant 0 : index
    %c0_5 = arith.constant 0 : index
    %5 = vector.load %arg2[%c0_4, %c0_5] : memref<128x128xf32, #tpu.memory_space<vmem>>, vector<128x128xf32>
    %cst = arith.constant dense<0.000000e+00> : vector<128x128xf32>
    %6 = tpu.matmul %4, %5, %cst {dimension_numbers = #tpu.dot_dimension_numbers<[1], [0], [0], [1], [0, 0, 1, 1], [], []>} : vector<128x128xf32>, vector<128x128xf32>, vector<128x128xf32> -> vector<128x128xf32>
    %7 = arith.addf %3, %6 : vector<128x128xf32>
    %c0_6 = arith.constant 0 : index
    %c0_7 = arith.constant 0 : index
    %8 = vector.load %arg9[%c0_6, %c0_7] : memref<128x128xf32, #tpu.memory_space<vmem>>, vector<128x128xf32>
    tpu.vector_store %arg9[%c0_6, %c0_7], %7 {strides = array<i32>} : memref<128x128xf32, #tpu.memory_space<vmem>>, vector<128x128xf32>,
    %c0_i32_8 = arith.constant 0 : i32
    %9 = arith.cmpi eq, %arg1, %c0_i32_8 : i32
    %10 = arith.extui %9 : i1 to i32
    %c0_i32_9 = arith.constant 0 : i32
    %11 = arith.cmpi ne, %10, %c0_i32_9 : i32
    scf.if %11 {
      %c0_10 = arith.constant 0 : index
      %c0_11 = arith.constant 0 : index
      %12 = vector.load %arg9[%c0_10, %c0_11] : memref<128x128xf32, #tpu.memory_space<vmem>>, vector<128x128xf32>
      %c0_12 = arith.constant 0 : index
      %c0_13 = arith.constant 0 : index
      %13 = vector.load %arg5[%c0_12, %c0_13] : memref<128x128xf32, #tpu.memory_space<vmem>>, vector<128x128xf32>
      %cst_14 = arith.constant dense<0.000000e+00> : vector<128x128xf32>
      %14 = tpu.matmul %12, %13, %cst_14 {dimension_numbers = #tpu.dot_dimension_numbers<[1], [0], [0], [1], [0, 0, 1, 1], [], []>} : vector<128x128xf32>, vector<128x128xf32>, vector<128x128xf32> -> vector<128x128xf32>
      %c0_15 = arith.constant 0 : index
      %c0_16 = arith.constant 0 : index
      %15 = vector.load %arg6[%c0_15, %c0_16] : memref<1x128xf32, #tpu.memory_space<vmem>>, vector<1x128xf32>
      %16 = vector.broadcast %15 : vector<1x128xf32> to vector<128x128xf32>
      %17 = arith.addf %14, %16 : vector<128x128xf32>
      %c0_17 = arith.constant 0 : index
      %c0_18 = arith.constant 0 : index
      %18 = vector.load %arg10[%c0_17, %c0_18] : memref<128x128xf32, #tpu.memory_space<vmem>>, vector<128x128xf32>
      %19 = arith.addf %17, %18 : vector<128x128xf32>
      %cst_19 = arith.constant 0.000000e+00 : f32
      %20 = vector.broadcast %cst_19 : f32 to vector<128x128xf32>
      %21 = arith.maximumf %19, %20 : vector<128x128xf32>
      %c0_20 = arith.constant 0 : index
      %c0_21 = arith.constant 0 : index
      %22 = vector.load %arg8[%c0_20, %c0_21] : memref<128x128xf32, #tpu.memory_space<vmem>>, vector<128x128xf32>
      tpu.vector_store %arg8[%c0_20, %c0_21], %21 {strides = array<i32>} : memref<128x128xf32, #tpu.memory_space<vmem>>, vector<128x128xf32>,
    } else {
    }
    return
  }
  func.func @transform_0(%arg0: i32, %arg1: i32) -> (i32, i32) {
    %c0_i32 = arith.constant 0 : i32
    %c0_i32_0 = arith.constant 0 : i32
    return %arg1, %c0_i32 : i32, i32
  }
  func.func @transform_1(%arg0: i32, %arg1: i32) -> (i32, i32) {
    %c0_i32 = arith.constant 0 : i32
    return %arg0, %arg1 : i32, i32
  }
  func.func @transform_2(%arg0: i32, %arg1: i32) -> (i32, i32) {
    %c0_i32 = arith.constant 0 : i32
    %c0_i32_0 = arith.constant 0 : i32
    return %arg0, %c0_i32 : i32, i32
  }
  func.func @transform_3(%arg0: i32, %arg1: i32) -> (i32, i32) {
    %c0_i32 = arith.constant 0 : i32
    %c0_i32_0 = arith.constant 0 : i32
    %c0_i32_1 = arith.constant 0 : i32
    return %c0_i32, %c0_i32_0 : i32, i32
  }
  func.func @transform_4(%arg0: i32, %arg1: i32) -> (i32, i32) {
    %c0_i32 = arith.constant 0 : i32
    %c0_i32_0 = arith.constant 0 : i32
    %c0_i32_1 = arith.constant 0 : i32
    return %c0_i32, %c0_i32_0 : i32, i32
  }
  func.func @transform_5(%arg0: i32, %arg1: i32) -> (i32, i32) {
    %c0_i32 = arith.constant 0 : i32
    %c0_i32_0 = arith.constant 0 : i32
    %c0_i32_1 = arith.constant 0 : i32
    return %c0_i32, %c0_i32_0 : i32, i32
  }
  func.func @transform_6(%arg0: i32, %arg1: i32) -> (i32, i32) {
    %c0_i32 = arith.constant 0 : i32
    %c0_i32_0 = arith.constant 0 : i32
    return %arg0, %c0_i32 : i32, i32
  }
}

module attributes {stable_mosaic.version = 11 : i64} {
  func.func @_sage_layer_kernel(%arg0: i32, %arg1: i32, %arg2: memref<128x128xf32, #tpu.memory_space<vmem>>, %arg3: memref<128x128xf32, #tpu.memory_space<vmem>>, %arg4: memref<128x128xf32, #tpu.memory_space<vmem>>, %arg5: memref<128x128xf32, #tpu.memory_space<vmem>>, %arg6: memref<1x128xf32, #tpu.memory_space<vmem>>, %arg7: memref<128x128xf32, #tpu.memory_space<vmem>>, %arg8: memref<128x128xf32, #tpu.memory_space<vmem>>, %arg9: memref<128x128xf32, #tpu.memory_space<vmem>>, %arg10: memref<128x128xf32, #tpu.memory_space<vmem>>) attributes {dimension_semantics = [#tpu.dimension_semantics<parallel>, #tpu.dimension_semantics<arbitrary>], iteration_bounds = array<i64: 1, 1>, scalar_prefetch = 0 : i64, scratch_operands = 2 : i64, tpu.core_type = #tpu.core_type<tc>, window_params = [{transform_indices = @transform_0, window_bounds = array<i64: 128, 128>}, {transform_indices = @transform_1, window_bounds = array<i64: 128, 128>}, {transform_indices = @transform_2, window_bounds = array<i64: 128, 128>}, {pipeline_mode = #tpu.pipeline_mode<synchronous>, transform_indices = @transform_3, window_bounds = array<i64: 128, 128>}, {pipeline_mode = #tpu.pipeline_mode<synchronous>, transform_indices = @transform_4, window_bounds = array<i64: 1, 128>}, {pipeline_mode = #tpu.pipeline_mode<synchronous>, transform_indices = @transform_5, window_bounds = array<i64: 128, 128>}, {transform_indices = @transform_6, window_bounds = array<i64: 128, 128>}]} {
    %c0_i32 = arith.constant 0 : i32
    %0 = arith.cmpi eq, %arg1, %c0_i32 : i32
    %1 = arith.extui %0 : i1 to i32
    %c0_i32_0 = arith.constant 0 : i32
    %2 = arith.cmpi ne, %1, %c0_i32_0 : i32
    scf.if %2 {
      %cst_10 = arith.constant 0.000000e+00 : f32
      %12 = vector.broadcast %cst_10 : f32 to vector<128x128xf32>
      %c0_11 = arith.constant 0 : index
      %c0_12 = arith.constant 0 : index
      %13 = vector.load %arg9[%c0_11, %c0_12] : memref<128x128xf32, #tpu.memory_space<vmem>>, vector<128x128xf32>
      tpu.vector_store %arg9[%c0_11, %c0_12], %12 {strides = array<i32>} : memref<128x128xf32, #tpu.memory_space<vmem>>, vector<128x128xf32>,
      %c0_13 = arith.constant 0 : index
      %c0_14 = arith.constant 0 : index
      %14 = vector.load %arg4[%c0_13, %c0_14] : memref<128x128xf32, #tpu.memory_space<vmem>>, vector<128x128xf32>
      %c0_15 = arith.constant 0 : index
      %c0_16 = arith.constant 0 : index
      %15 = vector.load %arg7[%c0_15, %c0_16] : memref<128x128xf32, #tpu.memory_space<vmem>>, vector<128x128xf32>
      %cst_17 = arith.constant dense<0.000000e+00> : vector<128x128xf32>
      %16 = tpu.matmul %14, %15, %cst_17 {dimension_numbers = #tpu.dot_dimension_numbers<[1], [0], [0], [1], [0, 0, 1, 1], [], []>} : vector<128x128xf32>, vector<128x128xf32>, vector<128x128xf32> -> vector<128x128xf32>
      %c0_18 = arith.constant 0 : index
      %c0_19 = arith.constant 0 : index
      %17 = vector.load %arg10[%c0_18, %c0_19] : memref<128x128xf32, #tpu.memory_space<vmem>>, vector<128x128xf32>
      tpu.vector_store %arg10[%c0_18, %c0_19], %16 {strides = array<i32>} : memref<128x128xf32, #tpu.memory_space<vmem>>, vector<128x128xf32>,
    } else {
    }
    %c0 = arith.constant 0 : index
    %c0_1 = arith.constant 0 : index
    %3 = vector.load %arg9[%c0, %c0_1] : memref<128x128xf32, #tpu.memory_space<vmem>>, vector<128x128xf32>
    %c0_2 = arith.constant 0 : index
    %c0_3 = arith.constant 0 : index
    %4 = vector.load %arg3[%c0_2, %c0_3] : memref<128x128xf32, #tpu.memory_space<vmem>>, vector<128x128xf32>
    %c0_4 = arith.constant 0 : index
    %c0_5 = arith.constant 0 : index
    %5 = vector.load %arg2[%c0_4, %c0_5] : memref<128x128xf32, #tpu.memory_space<vmem>>, vector<128x128xf32>
    %cst = arith.constant dense<0.000000e+00> : vector<128x128xf32>
    %6 = tpu.matmul %4, %5, %cst {dimension_numbers = #tpu.dot_dimension_numbers<[1], [0], [0], [1], [0, 0, 1, 1], [], []>} : vector<128x128xf32>, vector<128x128xf32>, vector<128x128xf32> -> vector<128x128xf32>
    %7 = arith.addf %3, %6 : vector<128x128xf32>
    %c0_6 = arith.constant 0 : index
    %c0_7 = arith.constant 0 : index
    %8 = vector.load %arg9[%c0_6, %c0_7] : memref<128x128xf32, #tpu.memory_space<vmem>>, vector<128x128xf32>
    tpu.vector_store %arg9[%c0_6, %c0_7], %7 {strides = array<i32>} : memref<128x128xf32, #tpu.memory_space<vmem>>, vector<128x128xf32>,
    %c0_i32_8 = arith.constant 0 : i32
    %9 = arith.cmpi eq, %arg1, %c0_i32_8 : i32
    %10 = arith.extui %9 : i1 to i32
    %c0_i32_9 = arith.constant 0 : i32
    %11 = arith.cmpi ne, %10, %c0_i32_9 : i32
    scf.if %11 {
      %c0_10 = arith.constant 0 : index
      %c0_11 = arith.constant 0 : index
      %12 = vector.load %arg9[%c0_10, %c0_11] : memref<128x128xf32, #tpu.memory_space<vmem>>, vector<128x128xf32>
      %c0_12 = arith.constant 0 : index
      %c0_13 = arith.constant 0 : index
      %13 = vector.load %arg5[%c0_12, %c0_13] : memref<128x128xf32, #tpu.memory_space<vmem>>, vector<128x128xf32>
      %cst_14 = arith.constant dense<0.000000e+00> : vector<128x128xf32>
      %14 = tpu.matmul %12, %13, %cst_14 {dimension_numbers = #tpu.dot_dimension_numbers<[1], [0], [0], [1], [0, 0, 1, 1], [], []>} : vector<128x128xf32>, vector<128x128xf32>, vector<128x128xf32> -> vector<128x128xf32>
      %c0_15 = arith.constant 0 : index
      %c0_16 = arith.constant 0 : index
      %15 = vector.load %arg6[%c0_15, %c0_16] : memref<1x128xf32, #tpu.memory_space<vmem>>, vector<1x128xf32>
      %16 = vector.broadcast %15 : vector<1x128xf32> to vector<128x128xf32>
      %17 = arith.addf %14, %16 : vector<128x128xf32>
      %c0_17 = arith.constant 0 : index
      %c0_18 = arith.constant 0 : index
      %18 = vector.load %arg10[%c0_17, %c0_18] : memref<128x128xf32, #tpu.memory_space<vmem>>, vector<128x128xf32>
      %19 = arith.addf %17, %18 : vector<128x128xf32>
      %c0_19 = arith.constant 0 : index
      %c0_20 = arith.constant 0 : index
      %20 = vector.load %arg8[%c0_19, %c0_20] : memref<128x128xf32, #tpu.memory_space<vmem>>, vector<128x128xf32>
      tpu.vector_store %arg8[%c0_19, %c0_20], %19 {strides = array<i32>} : memref<128x128xf32, #tpu.memory_space<vmem>>, vector<128x128xf32>,
    } else {
    }
    return
  }
  func.func @transform_0(%arg0: i32, %arg1: i32) -> (i32, i32) {
    %c0_i32 = arith.constant 0 : i32
    %c0_i32_0 = arith.constant 0 : i32
    return %arg1, %c0_i32 : i32, i32
  }
  func.func @transform_1(%arg0: i32, %arg1: i32) -> (i32, i32) {
    %c0_i32 = arith.constant 0 : i32
    return %arg0, %arg1 : i32, i32
  }
  func.func @transform_2(%arg0: i32, %arg1: i32) -> (i32, i32) {
    %c0_i32 = arith.constant 0 : i32
    %c0_i32_0 = arith.constant 0 : i32
    return %arg0, %c0_i32 : i32, i32
  }
  func.func @transform_3(%arg0: i32, %arg1: i32) -> (i32, i32) {
    %c0_i32 = arith.constant 0 : i32
    %c0_i32_0 = arith.constant 0 : i32
    %c0_i32_1 = arith.constant 0 : i32
    return %c0_i32, %c0_i32_0 : i32, i32
  }
  func.func @transform_4(%arg0: i32, %arg1: i32) -> (i32, i32) {
    %c0_i32 = arith.constant 0 : i32
    %c0_i32_0 = arith.constant 0 : i32
    %c0_i32_1 = arith.constant 0 : i32
    return %c0_i32, %c0_i32_0 : i32, i32
  }
  func.func @transform_5(%arg0: i32, %arg1: i32) -> (i32, i32) {
    %c0_i32 = arith.constant 0 : i32
    %c0_i32_0 = arith.constant 0 : i32
    %c0_i32_1 = arith.constant 0 : i32
    return %c0_i32, %c0_i32_0 : i32, i32
  }
  func.func @transform_6(%arg0: i32, %arg1: i32) -> (i32, i32) {
    %c0_i32 = arith.constant 0 : i32
    %c0_i32_0 = arith.constant 0 : i32
    return %arg0, %c0_i32 : i32, i32
  }
}

</mosaic_0001>

<bundles_post_ra>
// kernel: graphsage_link_predictor.5
= control target key start
LH: loop header
LB: loop body
LE: loop exit
PB: predicated region body
PF: predicated region fallthrough
CT: control target
= control target key end

     0   :  { %s1215_s3 = inlined_call_operand.vmem [shape: f32[128,128], index: 3, kind: input, shape index: {}]   ;;  %s1216_s2 = inlined_call_operand.vmem [shape: f32[128,128], index: 2, kind: input, shape index: {}]   ;;  %s1217_s1 = inlined_call_operand.vmem [shape: f32[128,128], index: 1, kind: input, shape index: {}]   ;;  %s1218_s0 = inlined_call_operand.vmem [shape: f32[128,128], index: 0, kind: input, shape index: {}]   ;;  %s1219_s4 = inlined_call_operand.vmem [shape: f32[1,128], index: 4, kind: input, shape index: {}]   ;;  %s1220_s5 = inlined_call_operand.vmem [shape: f32[1,128], index: 5, kind: input, shape index: {}]   ;;  %s1221_s6 = inlined_call_operand.vmem [shape: f32[1,128], index: 6, kind: input, shape index: {}]   ;;  %s1222_s7 = inlined_call_operand.vmem [shape: f32[128,128], index: 7, kind: output, shape index: {}]  }
   0x1   :  { %v89_v0 = vld [vmem:[%s1215_s3 + $0x78] sm:$0xff]  ;;  %v88_v2 = vld [vmem:[%s1215_s3 + $0x70] sm:$0xff]  ;;  %v87_v4 = vld [vmem:[%s1215_s3 + $0x68] sm:$0xff] }
   0x2   :  { %v57_v1 = vld [vmem:[%s1216_s2 + $0x78] sm:$0xff]  ;;  %696 = vmatprep.subr.mxu0 %v89_v0  ;;  %v56_v3 = vld [vmem:[%s1216_s2 + $0x70] sm:$0xff]  ;;  %v55_v5 = vld [vmem:[%s1216_s2 + $0x68] sm:$0xff] }
   0x3   :  { %752 = vmatprep.subr.mxu1 %v57_v1  ;;  %697 = vmatpush3.msra.mxu0 %v89_v0  ;;  %v86_v6 = vld [vmem:[%s1215_s3 + $0x60] sm:$0xff]  ;;  %v85_v8 = vld [vmem:[%s1215_s3 + $0x58] sm:$0xff]  ;;  %v84_v10 = vld [vmem:[%s1215_s3 + $0x50] sm:$0xff] }
   0x4   :  { %753 = vmatpush3.msra.mxu1 %v57_v1  ;;  %698 = vmatprep.subr.mxu0 %v88_v2  ;;  %v54_v7 = vld [vmem:[%s1216_s2 + $0x60] sm:$0xff]  ;;  %v53_v9 = vld [vmem:[%s1216_s2 + $0x58] sm:$0xff]  ;;  %v52_v11 = vld [vmem:[%s1216_s2 + $0x50] sm:$0xff] }
   0x5   :  { %754 = vmatprep.subr.mxu1 %v56_v3  ;;  %699 = vmatpush3.msra.mxu0 %v88_v2  ;;  %v83_v12 = vld [vmem:[%s1215_s3 + $0x48] sm:$0xff]  ;;  %v82_v14 = vld [vmem:[%s1215_s3 + $0x40] sm:$0xff]  ;;  %v81_v16 = vld [vmem:[%s1215_s3 + $0x38] sm:$0xff] }
   0x6   :  { %755 = vmatpush3.msra.mxu1 %v56_v3  ;;  %700 = vmatprep.subr.mxu0 %v87_v4  ;;  %v51_v13 = vld [vmem:[%s1216_s2 + $0x48] sm:$0xff]  ;;  %v50_v15 = vld [vmem:[%s1216_s2 + $0x40] sm:$0xff]  ;;  %v49_v17 = vld [vmem:[%s1216_s2 + $0x38] sm:$0xff] }
   0x7   :  { %756 = vmatprep.subr.mxu1 %v55_v5  ;;  %701 = vmatpush3.msra.mxu0 %v87_v4  ;;  %v80_v18 = vld [vmem:[%s1215_s3 + $0x30] sm:$0xff]  ;;  %v79_v20 = vld [vmem:[%s1215_s3 + $0x28] sm:$0xff]  ;;  %v78_v22 = vld [vmem:[%s1215_s3 + $0x20] sm:$0xff] }
   0x8   :  { %757 = vmatpush3.msra.mxu1 %v55_v5  ;;  %702 = vmatprep.subr.mxu0 %v86_v6  ;;  %v48_v19 = vld [vmem:[%s1216_s2 + $0x30] sm:$0xff]  ;;  %v47_v21 = vld [vmem:[%s1216_s2 + $0x28] sm:$0xff]  ;;  %v46_v23 = vld [vmem:[%s1216_s2 + $0x20] sm:$0xff] }
   0x9   :  { %758 = vmatprep.subr.mxu1 %v54_v7  ;;  %703 = vmatpush3.msra.mxu0 %v86_v6  ;;  %v77_v24 = vld [vmem:[%s1215_s3 + $0x18] sm:$0xff]  ;;  %v76_v26 = vld [vmem:[%s1215_s3 + $0x10] sm:$0xff]  ;;  %v75_v28 = vld [vmem:[%s1215_s3 + $0x8] sm:$0xff] }
   0xa   :  { %759 = vmatpush3.msra.mxu1 %v54_v7  ;;  %704 = vmatprep.subr.mxu0 %v85_v8  ;;  %v45_v25 = vld [vmem:[%s1216_s2 + $0x18] sm:$0xff]  ;;  %v44_v27 = vld [vmem:[%s1216_s2 + $0x10] sm:$0xff]  ;;  %v43_v29 = vld [vmem:[%s1216_s2 + $0x8] sm:$0xff] }
   0xb   :  { %760 = vmatprep.subr.mxu1 %v53_v9  ;;  %705 = vmatpush3.msra.mxu0 %v85_v8  ;;  %v74_v30 = vld [vmem:[%s1215_s3] sm:$0xff]  ;;  %v59_v34 = vld [vmem:[%s1217_s1 + $0x8] sm:$0xff]  ;;  %v60_v36 = vld [vmem:[%s1217_s1 + $0x10] sm:$0xff] }
   0xc   :  { %761 = vmatpush3.msra.mxu1 %v53_v9  ;;  %706 = vmatprep.subr.mxu0 %v84_v10  ;;  %v42_v31 = vld [vmem:[%s1216_s2] sm:$0xff]  ;;  %v27_v35 = vld [vmem:[%s1218_s0 + $0x8] sm:$0xff]  ;;  %v28_v37 = vld [vmem:[%s1218_s0 + $0x10] sm:$0xff] }
   0xd   :  { %762 = vmatprep.subr.mxu1 %v52_v11  ;;  %707 = vmatpush3.msra.mxu0 %v84_v10  ;;  %v58_v32 = vld [vmem:[%s1217_s1] sm:$0xff]  ;;  %v61_v38 = vld [vmem:[%s1217_s1 + $0x18] sm:$0xff]  ;;  %v63_v42 = vld [vmem:[%s1217_s1 + $0x28] sm:$0xff] }
   0xe   :  { %763 = vmatpush3.msra.mxu1 %v52_v11  ;;  %708 = vmatprep.subr.mxu0 %v83_v12  ;;  %v26_v33 = vld [vmem:[%s1218_s0] sm:$0xff]  ;;  %v29_v39 = vld [vmem:[%s1218_s0 + $0x18] sm:$0xff]  ;;  %v31_v43 = vld [vmem:[%s1218_s0 + $0x28] sm:$0xff] }
   0xf   :  { %764 = vmatprep.subr.mxu1 %v51_v13  ;;  %709 = vmatpush3.msra.mxu0 %v83_v12  ;;  %v62_v40 = vld [vmem:[%s1217_s1 + $0x20] sm:$0xff]  ;;  %v64_v44 = vld [vmem:[%s1217_s1 + $0x30] sm:$0xff]  ;;  %v65_v46 = vld [vmem:[%s1217_s1 + $0x38] sm:$0xff] }
  0x10   :  { %765 = vmatpush3.msra.mxu1 %v51_v13  ;;  %710 = vmatprep.subr.mxu0 %v82_v14  ;;  %v30_v41 = vld [vmem:[%s1218_s0 + $0x20] sm:$0xff]  ;;  %v32_v45 = vld [vmem:[%s1218_s0 + $0x30] sm:$0xff]  ;;  %v33_v47 = vld [vmem:[%s1218_s0 + $0x38] sm:$0xff] }
  0x11   :  { %766 = vmatprep.subr.mxu1 %v50_v15  ;;  %711 = vmatpush3.msra.mxu0 %v82_v14  ;;  %v66_v48 = vld [vmem:[%s1217_s1 + $0x40] sm:$0xff]  ;;  %v67_v50 = vld [vmem:[%s1217_s1 + $0x48] sm:$0xff]  ;;  %v68_v52 = vld [vmem:[%s1217_s1 + $0x50] sm:$0xff] }
  0x12   :  { %767 = vmatpush3.msra.mxu1 %v50_v15  ;;  %712 = vmatprep.subr.mxu0 %v81_v16  ;;  %v34_v49 = vld [vmem:[%s1218_s0 + $0x40] sm:$0xff]  ;;  %v35_v51 = vld [vmem:[%s1218_s0 + $0x48] sm:$0xff]  ;;  %v36_v53 = vld [vmem:[%s1218_s0 + $0x50] sm:$0xff] }
  0x13   :  { %768 = vmatprep.subr.mxu1 %v49_v17  ;;  %713 = vmatpush3.msra.mxu0 %v81_v16  ;;  %v69_v54 = vld [vmem:[%s1217_s1 + $0x58] sm:$0xff]  ;;  %v70_v56 = vld [vmem:[%s1217_s1 + $0x60] sm:$0xff]  ;;  %v71_v58 = vld [vmem:[%s1217_s1 + $0x68] sm:$0xff] }
  0x14   :  { %769 = vmatpush3.msra.mxu1 %v49_v17  ;;  %714 = vmatprep.subr.mxu0 %v80_v18  ;;  %v37_v55 = vld [vmem:[%s1218_s0 + $0x58] sm:$0xff]  ;;  %v38_v57 = vld [vmem:[%s1218_s0 + $0x60] sm:$0xff]  ;;  %v39_v59 = vld [vmem:[%s1218_s0 + $0x68] sm:$0xff] }
  0x15   :  { %770 = vmatprep.subr.mxu1 %v48_v19  ;;  %715 = vmatpush3.msra.mxu0 %v80_v18  ;;  %v72_v60 = vld [vmem:[%s1217_s1 + $0x70] sm:$0xff]  ;;  %v73_v62 = vld [vmem:[%s1217_s1 + $0x78] sm:$0xff]  ;;  %v1107_v2 = vld [vmem:[%s1219_s4] ss:$0 sm:$0xff] }
  0x16   :  { %771 = vmatpush3.msra.mxu1 %v48_v19  ;;  %716 = vmatprep.subr.mxu0 %v79_v20  ;;  %v40_v61 = vld [vmem:[%s1218_s0 + $0x70] sm:$0xff]  ;;  %v41_v63 = vld [vmem:[%s1218_s0 + $0x78] sm:$0xff]  ;;  %v1113_v10 = vld [vmem:[%s1220_s5] ss:$0 sm:$0xff] }
  0x17   :  { %772 = vmatprep.subr.mxu1 %v47_v21  ;;  %717 = vmatpush3.msra.mxu0 %v79_v20 }
  0x18   :  { %773 = vmatpush3.msra.mxu1 %v47_v21  ;;  %718 = vmatprep.subr.mxu0 %v78_v22 }
  0x19   :  { %774 = vmatprep.subr.mxu1 %v46_v23  ;;  %719 = vmatpush3.msra.mxu0 %v78_v22 }
  0x1a   :  { %775 = vmatpush3.msra.mxu1 %v46_v23  ;;  %720 = vmatprep.subr.mxu0 %v77_v24 }
  0x1b   :  { %776 = vmatprep.subr.mxu1 %v45_v25  ;;  %721 = vmatpush3.msra.mxu0 %v77_v24 }
  0x1c   :  { %777 = vmatpush3.msra.mxu1 %v45_v25  ;;  %722 = vmatprep.subr.mxu0 %v76_v26 }
  0x1d   :  { %778 = vmatprep.subr.mxu1 %v44_v27  ;;  %723 = vmatpush3.msra.mxu0 %v76_v26 }
  0x1e   :  { %779 = vmatpush3.msra.mxu1 %v44_v27  ;;  %724 = vmatprep.subr.mxu0 %v75_v28 }
  0x1f   :  { %780 = vmatprep.subr.mxu1 %v43_v29  ;;  %725 = vmatpush3.msra.mxu0 %v75_v28 }
  0x20   :  { %781 = vmatpush3.msra.mxu1 %v43_v29  ;;  %726 = vmatprep.subr.mxu0 %v74_v30 }
  0x21   :  { %782 = vmatprep.subr.mxu1 %v42_v31  ;;  %727 = vmatpush3.msra.mxu0 %v74_v30 }
  0x22   :  { %728 = vmatprep.mubr.f32.mxu0 %v58_v32  ;;  %783 = vmatpush3.msra.mxu1 %v42_v31 }
  0x23   :  { %784 = vmatprep.mubr.f32.mxu1 %v26_v33  ;;  %729 = vmatmul.mubr.f32.vlgmr.msra.gmra.mxu0 %v59_v34 }
  0x24   :  { %785 = vmatmul.mubr.f32.vlgmr.msra.gmra.mxu1 %v27_v35  ;;  %731 = vmatprep.mubr.f32.mxu0 %v60_v36 }
  0x25   :  { %787 = vmatprep.mubr.f32.mxu1 %v28_v37 }
  0x27   :  { %732 = vmatmul.mubr.f32.gmra.mxu0 %v61_v38 }
  0x28   :  { %788 = vmatmul.mubr.f32.gmra.mxu1 %v29_v39  ;;  %734 = vmatprep.mubr.f32.mxu0 %v62_v40 }
  0x29   :  { %790 = vmatprep.mubr.f32.mxu1 %v30_v41 }
  0x2b   :  { %735 = vmatmul.mubr.f32.gmra.mxu0 %v63_v42 }
  0x2c   :  { %791 = vmatmul.mubr.f32.gmra.mxu1 %v31_v43  ;;  %737 = vmatprep.mubr.f32.mxu0 %v64_v44 }
  0x2d   :  { %793 = vmatprep.mubr.f32.mxu1 %v32_v45 }
  0x2f   :  { %738 = vmatmul.mubr.f32.gmra.mxu0 %v65_v46 }
  0x30   :  { %794 = vmatmul.mubr.f32.gmra.mxu1 %v33_v47  ;;  %740 = vmatprep.mubr.f32.mxu0 %v66_v48 }
  0x31   :  { %796 = vmatprep.mubr.f32.mxu1 %v34_v49 }
  0x33   :  { %741 = vmatmul.mubr.f32.gmra.mxu0 %v67_v50 }
  0x34   :  { %797 = vmatmul.mubr.f32.gmra.mxu1 %v35_v51  ;;  %743 = vmatprep.mubr.f32.mxu0 %v68_v52 }
  0x35   :  { %799 = vmatprep.mubr.f32.mxu1 %v36_v53 }
  0x37   :  { %744 = vmatmul.mubr.f32.gmra.mxu0 %v69_v54 }
  0x38   :  { %800 = vmatmul.mubr.f32.gmra.mxu1 %v37_v55  ;;  %746 = vmatprep.mubr.f32.mxu0 %v70_v56 }
  0x39   :  { %802 = vmatprep.mubr.f32.mxu1 %v38_v57 }
  0x3b   :  { %747 = vmatmul.mubr.f32.gmra.mxu0 %v71_v58 }
  0x3c   :  { %803 = vmatmul.mubr.f32.gmra.mxu1 %v39_v59  ;;  %749 = vmatprep.mubr.f32.mxu0 %v72_v60 }
  0x3d   :  { %805 = vmatprep.mubr.f32.mxu1 %v40_v61 }
  0x3f   :  { %750 = vmatmul.mubr.f32.gmra.mxu0 %v73_v62 }
  0x40   :  { %806 = vmatmul.mubr.f32.gmra.mxu1 %v41_v63 }
  0xe3   :  { %v730_v0 = vpop.f32.mrf.mxu0 }
  0xe4   :  { %v786_v1 = vpop.f32.mrf.mxu1 }
  0xe5   :  { %v307_v3 = vadd.f32 %v786_v1, %v730_v0  ;;  %v156_v4 = vpop.f32.mrf.mxu0 }
  0xe6   :  { %v301_v5 = vpop.f32.mrf.mxu1 }
  0xe7   :  { %v302_v6 = vadd.f32 %v301_v5, %v156_v4  ;;  %v388_v7 = vadd.f32 %v1107_v2, %v307_v3  ;;  %v733_v8 = vpop.f32.mrf.mxu0 }
  0xe8   :  { %v789_v9 = vpop.f32.mrf.mxu1 }
  0xe9   :  { %v387_v11 = vadd.f32 %v1107_v2, %v302_v6  ;;  %v317_v12 = vadd.f32 %v789_v9, %v733_v8  ;;  %v404_v13 = vmax.f32 %v388_v7, 0.0  ;;  %v166_v14 = vpop.f32.mrf.mxu0 }
  0xea   :  { %v311_v15 = vpop.f32.mrf.mxu1 }
  0xeb   :  { %v403_v16 = vmax.f32 %v387_v11, 0.0  ;;  %v312_v17 = vadd.f32 %v311_v15, %v166_v14  ;;  %v427_v18 = vmul.f32 %v1113_v10, %v404_v13  ;;  %v390_v19 = vadd.f32 %v1107_v2, %v317_v12  ;;  %v736_v20 = vpop.f32.mrf.mxu0 }
  0xec   :  { %v792_v21 = vpop.f32.mrf.mxu1 }
  0xed   :  { %v389_v22 = vadd.f32 %v1107_v2, %v312_v17  ;;  %v327_v23 = vadd.f32 %v792_v21, %v736_v20  ;;  %444 = vadd.xlane.f32.xlu0 %v427_v18  ;;  %v406_v24 = vmax.f32 %v390_v19, 0.0  ;;  %v176_v25 = vpop.f32.mrf.mxu0  ;;  %v426_v27 = vmul.f32 %v1113_v10, %v403_v16 }
  0xee   :  { %v321_v26 = vpop.f32.mrf.mxu1 }
  0xef   :  { %v405_v28 = vmax.f32 %v389_v22, 0.0  ;;  %v392_v29 = vadd.f32 %v1107_v2, %v327_v23  ;;  %v322_v30 = vadd.f32 %v321_v26, %v176_v25  ;;  %v429_v31 = vmul.f32 %v1113_v10, %v406_v24  ;;  %v739_v32 = vpop.f32.mrf.mxu0 }
  0xf0   :  { %v795_v33 = vpop.f32.mrf.mxu1 }
  0xf1   :  { %v391_v34 = vadd.f32 %v1107_v2, %v322_v30  ;;  %v337_v35 = vadd.f32 %v795_v33, %v739_v32  ;;  %448 = vadd.xlane.f32.xlu1 %v429_v31  ;;  %442 = vadd.xlane.f32.xlu0 %v426_v27  ;;  %v408_v36 = vmax.f32 %v392_v29, 0.0  ;;  %v186_v37 = vpop.f32.mrf.mxu0  ;;  %v428_v42 = vmul.f32 %v1113_v10, %v405_v28 }
  0xf2   :  { %v331_v38 = vpop.f32.mrf.mxu1 }
  0xf3   :  { %v407_v39 = vmax.f32 %v391_v34, 0.0  ;;  %v394_v40 = vadd.f32 %v1107_v2, %v337_v35  ;;  %v332_v41 = vadd.f32 %v331_v38, %v186_v37  ;;  %v742_v43 = vpop.f32.mrf.mxu0  ;;  %v431_v54 = vmul.f32 %v1113_v10, %v408_v36  ;;  %v1149_v36 = vld [vmem:[%s1221_s6] ss:$0 sm:$0xff] }
  0xf4   :  { %v798_v44 = vpop.f32.mrf.mxu1 }
  0xf5   :  { %v393_v45 = vadd.f32 %v1107_v2, %v332_v41  ;;  %v347_v46 = vadd.f32 %v798_v44, %v742_v43  ;;  %446 = vadd.xlane.f32.xlu1 %v428_v42  ;;  %v430_v47 = vmul.f32 %v1113_v10, %v407_v39  ;;  %v410_v48 = vmax.f32 %v394_v40, 0.0  ;;  %v196_v49 = vpop.f32.mrf.mxu0 }
  0xf6   :  { %v341_v50 = vpop.f32.mrf.mxu1 }
  0xf7   :  { %v409_v51 = vmax.f32 %v393_v45, 0.0  ;;  %v396_v52 = vadd.f32 %v1107_v2, %v347_v46  ;;  %v342_v53 = vadd.f32 %v341_v50, %v196_v49  ;;  %450 = vadd.xlane.f32.xlu0 %v430_v47  ;;  %v745_v55 = vpop.f32.mrf.mxu0  ;;  %v433_v62 = vmul.f32 %v1113_v10, %v410_v48 }
  0xf8   :  { %v801_v56 = vpop.f32.mrf.mxu1 }
  0xf9   :  { %v395_v57 = vadd.f32 %v1107_v2, %v342_v53  ;;  %v357_v58 = vadd.f32 %v801_v56, %v745_v55  ;;  %452 = vadd.xlane.f32.xlu1 %v431_v54  ;;  %v432_v59 = vmul.f32 %v1113_v10, %v409_v51  ;;  %v206_v60 = vpop.f32.mrf.mxu0  ;;  %v412_v63 = vmax.f32 %v396_v52, 0.0 }
  0xfa   :  { %v351_v61 = vpop.f32.mrf.mxu1 }
  0xfb   :  { %v411_v0 = vmax.f32 %v395_v57, 0.0  ;;  %v398_v1 = vadd.f32 %v1107_v2, %v357_v58  ;;  %v352_v3 = vadd.f32 %v351_v61, %v206_v60  ;;  %454 = vadd.xlane.f32.xlu0 %v432_v59  ;;  %v748_v4 = vpop.f32.mrf.mxu0  ;;  %v435_v16 = vmul.f32 %v1113_v10, %v412_v63 }
  0xfc   :  { %v804_v5 = vpop.f32.mrf.mxu1 }
  0xfd   :  { %v397_v6 = vadd.f32 %v1107_v2, %v352_v3  ;;  %v367_v7 = vadd.f32 %v804_v5, %v748_v4  ;;  %456 = vadd.xlane.f32.xlu1 %v433_v62  ;;  %v434_v8 = vmul.f32 %v1113_v10, %v411_v0  ;;  %v414_v9 = vmax.f32 %v398_v1, 0.0  ;;  %v216_v11 = vpop.f32.mrf.mxu0 }
  0xfe   :  { %v361_v12 = vpop.f32.mrf.mxu1 }
  0xff   :  { %v413_v13 = vmax.f32 %v397_v6, 0.0  ;;  %v400_v14 = vadd.f32 %v1107_v2, %v367_v7  ;;  %v362_v15 = vadd.f32 %v361_v12, %v216_v11  ;;  %458 = vadd.xlane.f32.xlu0 %v434_v8  ;;  %v751_v17 = vpop.f32.mrf.mxu0  ;;  %v437_v24 = vmul.f32 %v1113_v10, %v414_v9 }
 0x100   :  { %v807_v18 = vpop.f32.mrf.mxu1 }
 0x101   :  { %v399_v19 = vadd.f32 %v1107_v2, %v362_v15  ;;  %v377_v20 = vadd.f32 %v807_v18, %v751_v17  ;;  %460 = vadd.xlane.f32.xlu1 %v435_v16  ;;  %v436_v21 = vmul.f32 %v1113_v10, %v413_v13  ;;  %v226_v22 = vpop.f32.mrf.mxu0  ;;  %v416_v25 = vmax.f32 %v400_v14, 0.0 }
 0x102   :  { %v371_v23 = vpop.f32.mrf.mxu1 }
 0x103   :  { %v415_v26 = vmax.f32 %v399_v19, 0.0  ;;  %v402_v27 = vadd.f32 %v1107_v2, %v377_v20  ;;  %v372_v28 = vadd.f32 %v371_v23, %v226_v22  ;;  %462 = vadd.xlane.f32.xlu0 %v436_v21  ;;  %v439_v33 = vmul.f32 %v1113_v10, %v416_v25 }
 0x105   :  { %v401_v29 = vadd.f32 %v1107_v2, %v372_v28  ;;  %464 = vadd.xlane.f32.xlu1 %v437_v24  ;;  %v438_v30 = vmul.f32 %v1113_v10, %v415_v26  ;;  %v418_v31 = vmax.f32 %v402_v27, 0.0 }
 0x107   :  { %v417_v32 = vmax.f32 %v401_v29, 0.0  ;;  %466 = vadd.xlane.f32.xlu0 %v438_v30  ;;  %v441_v35 = vmul.f32 %v1113_v10, %v418_v31 }
 0x109   :  { %468 = vadd.xlane.f32.xlu1 %v439_v33  ;;  %v440_v34 = vmul.f32 %v1113_v10, %v417_v32 }
 0x10b   :  { %470 = vadd.xlane.f32.xlu0 %v440_v34 }
 0x10d   :  { %472 = vadd.xlane.f32.xlu1 %v441_v35 }
 0x176   :  { %v445_v2 = vpop.xlane.xlu0 %444 }
 0x177   :  { %v482_v37 = vadd.f32 %v1149_v36, %v445_v2 }
 0x179   :  { %v617_v38 = vmul.f32 -1.442695, %v482_v37 }
 0x17a   :  { %v449_v39 = vpop.xlane.xlu1 %448  ;;  %v443_v40 = vpop.xlane.xlu0 %442 }
 0x17b   :  { %808 = vpow2.f32 %v617_v38  ;;  %v484_v41 = vadd.f32 %v1149_v36, %v449_v39  ;;  %v481_v42 = vadd.f32 %v1149_v36, %v443_v40 }
 0x17d   :  { %v619_v43 = vmul.f32 -1.442695, %v484_v41  ;;  %v616_v44 = vmul.f32 -1.442695, %v481_v42 }
 0x17e   :  { %v447_v10 = vpop.xlane.xlu1 %446 }
 0x17f   :  { %810 = vpow2.f32 %v619_v43  ;;  %v483_v45 = vadd.f32 %v1149_v36, %v447_v10 }
 0x180   :  { %812 = vpow2.f32 %v616_v44  ;;  %v451_v46 = vpop.xlane.xlu0 %450 }
 0x181   :  { %v618_v47 = vmul.f32 -1.442695, %v483_v45  ;;  %v485_v48 = vadd.f32 %v1149_v36, %v451_v46 }
 0x182   :  { %v453_v49 = vpop.xlane.xlu1 %452 }
 0x183   :  { %814 = vpow2.f32 %v618_v47  ;;  %v620_v50 = vmul.f32 -1.442695, %v485_v48  ;;  %v486_v51 = vadd.f32 %v1149_v36, %v453_v49 }
 0x184   :  { %v455_v52 = vpop.xlane.xlu0 %454 }
 0x185   :  { %816 = vpow2.f32 %v620_v50  ;;  %v621_v53 = vmul.f32 -1.442695, %v486_v51  ;;  %v487_v54 = vadd.f32 %v1149_v36, %v455_v52 }
 0x186   :  { %v457_v55 = vpop.xlane.xlu1 %456 }
 0x187   :  { %818 = vpow2.f32 %v621_v53  ;;  %v622_v56 = vmul.f32 -1.442695, %v487_v54  ;;  %v488_v57 = vadd.f32 %v1149_v36, %v457_v55 }
 0x188   :  { %v809_v58 = vpop.eup %808  ;;  %v459_v59 = vpop.xlane.xlu0 %458 }
 0x189   :  { %v546_v60 = vadd.f32 1.0, %v809_v58  ;;  %820 = vpow2.f32 %v622_v56  ;;  %v623_v61 = vmul.f32 -1.442695, %v488_v57  ;;  %v489_v62 = vadd.f32 %v1149_v36, %v459_v59 }
 0x18a   :  { %v461_v63 = vpop.xlane.xlu1 %460 }
 0x18b   :  { %822 = vrcp.f32 %v546_v60  ;;  %v624_v0 = vmul.f32 -1.442695, %v489_v62  ;;  %v490_v1 = vadd.f32 %v1149_v36, %v461_v63 }
 0x18c   :  { %v811_v3 = vpop.eup %810  ;;  %824 = vpow2.f32 %v623_v61  ;;  %v463_v4 = vpop.xlane.xlu0 %462 }
 0x18d   :  { %v813_v5 = vpop.eup %812  ;;  %v548_v6 = vadd.f32 1.0, %v811_v3  ;;  %826 = vpow2.f32 %v624_v0  ;;  %v625_v7 = vmul.f32 -1.442695, %v490_v1  ;;  %v491_v8 = vadd.f32 %v1149_v36, %v463_v4 }
 0x18e   :  { %v545_v9 = vadd.f32 1.0, %v813_v5  ;;  %v465_v11 = vpop.xlane.xlu1 %464 }
 0x18f   :  { %828 = vrcp.f32 %v548_v6  ;;  %v626_v12 = vmul.f32 -1.442695, %v491_v8  ;;  %v492_v13 = vadd.f32 %v1149_v36, %v465_v11 }
 0x190   :  { %v815_v14 = vpop.eup %814  ;;  %830 = vrcp.f32 %v545_v9  ;;  %v467_v15 = vpop.xlane.xlu0 %466 }
 0x191   :  { %v547_v16 = vadd.f32 1.0, %v815_v14  ;;  %832 = vpow2.f32 %v625_v7  ;;  %v627_v17 = vmul.f32 -1.442695, %v492_v13  ;;  %v493_v18 = vadd.f32 %v1149_v36, %v467_v15 }
 0x192   :  { %v817_v19 = vpop.eup %816  ;;  %834 = vpow2.f32 %v626_v12  ;;  %v469_v20 = vpop.xlane.xlu1 %468 }
 0x193   :  { %836 = vrcp.f32 %v547_v16  ;;  %v549_v21 = vadd.f32 1.0, %v817_v19  ;;  %v628_v22 = vmul.f32 -1.442695, %v493_v18  ;;  %v494_v23 = vadd.f32 %v1149_v36, %v469_v20 }
 0x194   :  { %v819_v24 = vpop.eup %818  ;;  %838 = vpow2.f32 %v627_v17  ;;  %v471_v25 = vpop.xlane.xlu0 %470 }
 0x195   :  { %840 = vrcp.f32 %v549_v21  ;;  %v550_v26 = vadd.f32 1.0, %v819_v24  ;;  %v629_v27 = vmul.f32 -1.442695, %v494_v23  ;;  %v495_v28 = vadd.f32 %v1149_v36, %v471_v25 }
 0x196   :  { %v821_v29 = vpop.eup %820  ;;  %842 = vpow2.f32 %v628_v22  ;;  %v473_v30 = vpop.xlane.xlu1 %472 }
 0x197   :  { %844 = vrcp.f32 %v550_v26  ;;  %v551_v31 = vadd.f32 1.0, %v821_v29  ;;  %v630_v32 = vmul.f32 -1.442695, %v495_v28  ;;  %v496_v33 = vadd.f32 %v1149_v36, %v473_v30 }
 0x198   :  { %v823_v34 = vpop.eup %822  ;;  %846 = vpow2.f32 %v629_v27 }
 0x199   :  { %v825_v35 = vpop.eup %824  ;;  %594 = vst [vmem:[%s1222_s7 + $0x8] sm:$0xff] %v823_v34  ;;  %848 = vrcp.f32 %v551_v31  ;;  %v631_v2 = vmul.f32 -1.442695, %v496_v33 }
 0x19a   :  { %v827_v37 = vpop.eup %826  ;;  %v552_v38 = vadd.f32 1.0, %v825_v35  ;;  %850 = vpow2.f32 %v630_v32 }
 0x19b   :  { %v553_v39 = vadd.f32 1.0, %v827_v37  ;;  %852 = vpow2.f32 %v631_v2 }
 0x19c   :  { %v829_v40 = vpop.eup %828  ;;  %854 = vrcp.f32 %v552_v38 }
 0x19d   :  { %v831_v41 = vpop.eup %830  ;;  %596 = vst [vmem:[%s1222_s7 + $0x18] sm:$0xff] %v829_v40  ;;  %856 = vrcp.f32 %v553_v39 }
 0x19e   :  { %v833_v36 = vpop.eup %832  ;;  %593 = vst [vmem:[%s1222_s7] sm:$0xff] %v831_v41 }
 0x19f   :  { %v835_v42 = vpop.eup %834  ;;  %v554_v43 = vadd.f32 1.0, %v833_v36 }
 0x1a0   :  { %v837_v44 = vpop.eup %836  ;;  %v555_v10 = vadd.f32 1.0, %v835_v42 }
 0x1a1   :  { %v839_v45 = vpop.eup %838  ;;  %595 = vst [vmem:[%s1222_s7 + $0x10] sm:$0xff] %v837_v44  ;;  %858 = vrcp.f32 %v554_v43 }
 0x1a2   :  { %v841_v46 = vpop.eup %840  ;;  %860 = vrcp.f32 %v555_v10  ;;  %v556_v47 = vadd.f32 1.0, %v839_v45 }
 0x1a3   :  { %v843_v48 = vpop.eup %842  ;;  %597 = vst [vmem:[%s1222_s7 + $0x20] sm:$0xff] %v841_v46 }
 0x1a4   :  { %v845_v49 = vpop.eup %844  ;;  %862 = vrcp.f32 %v556_v47  ;;  %v557_v50 = vadd.f32 1.0, %v843_v48 }
 0x1a5   :  { %v847_v51 = vpop.eup %846  ;;  %598 = vst [vmem:[%s1222_s7 + $0x28] sm:$0xff] %v845_v49 }
 0x1a6   :  { %v849_v52 = vpop.eup %848  ;;  %864 = vrcp.f32 %v557_v50  ;;  %v558_v53 = vadd.f32 1.0, %v847_v51 }
 0x1a7   :  { %v851_v54 = vpop.eup %850  ;;  %599 = vst [vmem:[%s1222_s7 + $0x30] sm:$0xff] %v849_v52 }
 0x1a8   :  { %v853_v55 = vpop.eup %852  ;;  %866 = vrcp.f32 %v558_v53  ;;  %v559_v56 = vadd.f32 1.0, %v851_v54 }
 0x1a9   :  { %v855_v57 = vpop.eup %854  ;;  %v560_v58 = vadd.f32 1.0, %v853_v55 }
 0x1aa   :  { %v857_v59 = vpop.eup %856  ;;  %600 = vst [vmem:[%s1222_s7 + $0x38] sm:$0xff] %v855_v57  ;;  %868 = vrcp.f32 %v559_v56 }
 0x1ab   :  { %601 = vst [vmem:[%s1222_s7 + $0x40] sm:$0xff] %v857_v59  ;;  %870 = vrcp.f32 %v560_v58 }
 0x1ae   :  { %v859_v60 = vpop.eup %858 }
 0x1af   :  { %v861_v61 = vpop.eup %860  ;;  %602 = vst [vmem:[%s1222_s7 + $0x48] sm:$0xff] %v859_v60 }
 0x1b0   :  { %603 = vst [vmem:[%s1222_s7 + $0x50] sm:$0xff] %v861_v61 }
 0x1b1   :  { %v863_v62 = vpop.eup %862 }
 0x1b2   :  { %604 = vst [vmem:[%s1222_s7 + $0x58] sm:$0xff] %v863_v62 }
 0x1b3   :  { %v865_v63 = vpop.eup %864 }
 0x1b4   :  { %605 = vst [vmem:[%s1222_s7 + $0x60] sm:$0xff] %v865_v63 }
 0x1b5   :  { %v867_v0 = vpop.eup %866 }
 0x1b6   :  { %606 = vst [vmem:[%s1222_s7 + $0x68] sm:$0xff] %v867_v0 }
 0x1b7   :  { %v869_v1 = vpop.eup %868 }
 0x1b8   :  { %v871_v3 = vpop.eup %870  ;;  %607 = vst [vmem:[%s1222_s7 + $0x70] sm:$0xff] %v869_v1 }
 0x1b9   :  { %608 = vst [vmem:[%s1222_s7 + $0x78] sm:$0xff] %v871_v3 }

// kernel: graphsage_link_predictor.4
= control target key start
LH: loop header
LB: loop body
LE: loop exit
PB: predicated region body
PF: predicated region fallthrough
CT: control target
= control target key end

     0   :  { %s1335_s0 = inlined_call_operand.vmem [shape: f32[128,128], index: 0, kind: input, shape index: {}, may-alias: {0,2}]   ;;  %s1336_s1 = inlined_call_operand.vmem [shape: f32[128,128], index: 1, kind: input, shape index: {}]   ;;  %s1337_s5 = inlined_call_operand.vmem [shape: f32[128,128], index: 5, kind: input, shape index: {}]   ;;  %s1338_s2 = inlined_call_operand.vmem [shape: f32[128,128], index: 2, kind: input, shape index: {}, may-alias: {0,2}]   ;;  %s1339_s3 = inlined_call_operand.vmem [shape: f32[128,128], index: 3, kind: input, shape index: {}]   ;;  %s1340_s4 = inlined_call_operand.vmem [shape: f32[1,128], index: 4, kind: input, shape index: {}]   ;;  %s1341_s6 = inlined_call_operand.vmem [shape: f32[128,128], index: 6, kind: output, shape index: {}]  }
   0x1   :  { %v283_v0 = vld [vmem:[%s1335_s0 + $0x78] sm:$0xff]  ;;  %v282_v1 = vld [vmem:[%s1335_s0 + $0x70] sm:$0xff]  ;;  %v281_v2 = vld [vmem:[%s1335_s0 + $0x68] sm:$0xff] }
   0x2   :  { %853 = vmatprep.subr.mxu1 %v283_v0  ;;  %v280_v3 = vld [vmem:[%s1335_s0 + $0x60] sm:$0xff]  ;;  %v279_v5 = vld [vmem:[%s1335_s0 + $0x58] sm:$0xff]  ;;  %v278_v6 = vld [vmem:[%s1335_s0 + $0x50] sm:$0xff] }
   0x3   :  { %854 = vmatpush3.msra.mxu1 %v283_v0  ;;  %v252_v4 = vld [vmem:[%s1336_s1] sm:$0xff]  ;;  %v277_v7 = vld [vmem:[%s1335_s0 + $0x48] sm:$0xff]  ;;  %v74_v8 = vld [vmem:[%s1337_s5 + $0x78] sm:$0xff] }
   0x4   :  { %855 = vmatprep.subr.mxu1 %v282_v1  ;;  %885 = vmatprep.mubr.f32.mxu1 %v252_v4  ;;  %v73_v9 = vld [vmem:[%s1337_s5 + $0x70] sm:$0xff]  ;;  %v276_v10 = vld [vmem:[%s1335_s0 + $0x40] sm:$0xff]  ;;  %v72_v11 = vld [vmem:[%s1337_s5 + $0x68] sm:$0xff] }
   0x5   :  { %856 = vmatpush3.msra.mxu1 %v282_v1  ;;  %797 = vmatprep.subr.mxu0 %v74_v8  ;;  %v275_v12 = vld [vmem:[%s1335_s0 + $0x38] sm:$0xff]  ;;  %v71_v13 = vld [vmem:[%s1337_s5 + $0x60] sm:$0xff]  ;;  %v274_v14 = vld [vmem:[%s1335_s0 + $0x30] sm:$0xff] }
   0x6   :  { %857 = vmatprep.subr.mxu1 %v281_v2  ;;  %798 = vmatpush3.msra.mxu0 %v74_v8  ;;  %v70_v15 = vld [vmem:[%s1337_s5 + $0x58] sm:$0xff]  ;;  %v273_v16 = vld [vmem:[%s1335_s0 + $0x28] sm:$0xff]  ;;  %v69_v17 = vld [vmem:[%s1337_s5 + $0x50] sm:$0xff] }
   0x7   :  { %858 = vmatpush3.msra.mxu1 %v281_v2  ;;  %799 = vmatprep.subr.mxu0 %v73_v9  ;;  %v272_v18 = vld [vmem:[%s1335_s0 + $0x20] sm:$0xff]  ;;  %v68_v19 = vld [vmem:[%s1337_s5 + $0x48] sm:$0xff]  ;;  %v271_v20 = vld [vmem:[%s1335_s0 + $0x18] sm:$0xff] }
   0x8   :  { %859 = vmatprep.subr.mxu1 %v280_v3  ;;  %800 = vmatpush3.msra.mxu0 %v73_v9  ;;  %v67_v21 = vld [vmem:[%s1337_s5 + $0x40] sm:$0xff]  ;;  %v270_v22 = vld [vmem:[%s1335_s0 + $0x10] sm:$0xff]  ;;  %v66_v23 = vld [vmem:[%s1337_s5 + $0x38] sm:$0xff] }
   0x9   :  { %860 = vmatpush3.msra.mxu1 %v280_v3  ;;  %801 = vmatprep.subr.mxu0 %v72_v11  ;;  %v269_v24 = vld [vmem:[%s1335_s0 + $0x8] sm:$0xff]  ;;  %v65_v25 = vld [vmem:[%s1337_s5 + $0x30] sm:$0xff]  ;;  %v268_v26 = vld [vmem:[%s1335_s0] sm:$0xff] }
   0xa   :  { %861 = vmatprep.subr.mxu1 %v279_v5  ;;  %802 = vmatpush3.msra.mxu0 %v72_v11  ;;  %v64_v27 = vld [vmem:[%s1337_s5 + $0x28] sm:$0xff]  ;;  %v63_v29 = vld [vmem:[%s1337_s5 + $0x20] sm:$0xff]  ;;  %v254_v30 = vld [vmem:[%s1336_s1 + $0x10] sm:$0xff] }
   0xb   :  { %862 = vmatpush3.msra.mxu1 %v279_v5  ;;  %803 = vmatprep.subr.mxu0 %v71_v13  ;;  %v253_v28 = vld [vmem:[%s1336_s1 + $0x8] sm:$0xff]  ;;  %v62_v31 = vld [vmem:[%s1337_s5 + $0x18] sm:$0xff]  ;;  %v43_v32 = vld [vmem:[%s1338_s2] sm:$0xff] }
   0xc   :  { %863 = vmatprep.subr.mxu1 %v278_v6  ;;  %804 = vmatpush3.msra.mxu0 %v71_v13  ;;  %v255_v33 = vld [vmem:[%s1336_s1 + $0x18] sm:$0xff]  ;;  %v61_v34 = vld [vmem:[%s1337_s5 + $0x10] sm:$0xff]  ;;  %v256_v35 = vld [vmem:[%s1336_s1 + $0x20] sm:$0xff] }
   0xd   :  { %864 = vmatpush3.msra.mxu1 %v278_v6  ;;  %805 = vmatprep.subr.mxu0 %v70_v15  ;;  %v495_v36 = vld [vmem:[%s1339_s3 + $0x78] sm:$0xff]  ;;  %v60_v37 = vld [vmem:[%s1337_s5 + $0x8] sm:$0xff]  ;;  %v59_v39 = vld [vmem:[%s1337_s5] sm:$0xff] }
   0xe   :  { %865 = vmatprep.subr.mxu1 %v277_v7  ;;  %806 = vmatpush3.msra.mxu0 %v70_v15  ;;  %v257_v38 = vld [vmem:[%s1336_s1 + $0x28] sm:$0xff]  ;;  %v258_v40 = vld [vmem:[%s1336_s1 + $0x30] sm:$0xff]  ;;  %v259_v44 = vld [vmem:[%s1336_s1 + $0x38] sm:$0xff] }
   0xf   :  { %866 = vmatpush3.msra.mxu1 %v277_v7  ;;  %807 = vmatprep.subr.mxu0 %v69_v17  ;;  %v1158_v41 = vld [vmem:[%s1339_s3 + $0x70] sm:$0xff]  ;;  %v44_v42 = vld [vmem:[%s1338_s2 + $0x8] sm:$0xff]  ;;  %v260_v45 = vld [vmem:[%s1336_s1 + $0x40] sm:$0xff] }
  0x10   :  { %867 = vmatprep.subr.mxu1 %v276_v10  ;;  %808 = vmatpush3.msra.mxu0 %v69_v17  ;;  %v45_v43 = vld [vmem:[%s1338_s2 + $0x10] sm:$0xff]  ;;  %v46_v46 = vld [vmem:[%s1338_s2 + $0x18] sm:$0xff]  ;;  %v493_v47 = vld [vmem:[%s1339_s3 + $0x68] sm:$0xff] }
  0x11   :  { %868 = vmatpush3.msra.mxu1 %v276_v10  ;;  %809 = vmatprep.subr.mxu0 %v68_v19  ;;  %v47_v48 = vld [vmem:[%s1338_s2 + $0x20] sm:$0xff]  ;;  %v261_v49 = vld [vmem:[%s1336_s1 + $0x48] sm:$0xff]  ;;  %v262_v51 = vld [vmem:[%s1336_s1 + $0x50] sm:$0xff] }
  0x12   :  { %869 = vmatprep.subr.mxu1 %v275_v12  ;;  %810 = vmatpush3.msra.mxu0 %v68_v19  ;;  %v492_v50 = vld [vmem:[%s1339_s3 + $0x60] sm:$0xff]  ;;  %v48_v52 = vld [vmem:[%s1338_s2 + $0x28] sm:$0xff]  ;;  %v491_v53 = vld [vmem:[%s1339_s3 + $0x58] sm:$0xff] }
  0x13   :  { %870 = vmatpush3.msra.mxu1 %v275_v12  ;;  %811 = vmatprep.subr.mxu0 %v67_v21  ;;  %v49_v54 = vld [vmem:[%s1338_s2 + $0x30] sm:$0xff]  ;;  %v263_v55 = vld [vmem:[%s1336_s1 + $0x58] sm:$0xff]  ;;  %v264_v57 = vld [vmem:[%s1336_s1 + $0x60] sm:$0xff] }
  0x14   :  { %871 = vmatprep.subr.mxu1 %v274_v14  ;;  %812 = vmatpush3.msra.mxu0 %v67_v21  ;;  %v490_v56 = vld [vmem:[%s1339_s3 + $0x50] sm:$0xff]  ;;  %v50_v58 = vld [vmem:[%s1338_s2 + $0x38] sm:$0xff]  ;;  %v489_v59 = vld [vmem:[%s1339_s3 + $0x48] sm:$0xff] }
  0x15   :  { %872 = vmatpush3.msra.mxu1 %v274_v14  ;;  %813 = vmatprep.subr.mxu0 %v66_v23  ;;  %v51_v60 = vld [vmem:[%s1338_s2 + $0x40] sm:$0xff]  ;;  %v265_v61 = vld [vmem:[%s1336_s1 + $0x68] sm:$0xff]  ;;  %v266_v63 = vld [vmem:[%s1336_s1 + $0x70] sm:$0xff] }
  0x16   :  { %873 = vmatprep.subr.mxu1 %v273_v16  ;;  %814 = vmatpush3.msra.mxu0 %v66_v23  ;;  %v488_v62 = vld [vmem:[%s1339_s3 + $0x40] sm:$0xff]  ;;  %v52_v0 = vld [vmem:[%s1338_s2 + $0x48] sm:$0xff]  ;;  %v487_v1 = vld [vmem:[%s1339_s3 + $0x38] sm:$0xff] }
  0x17   :  { %874 = vmatpush3.msra.mxu1 %v273_v16  ;;  %815 = vmatprep.subr.mxu0 %v65_v25  ;;  %v267_v2 = vld [vmem:[%s1336_s1 + $0x78] sm:$0xff]  ;;  %v486_v3 = vld [vmem:[%s1339_s3 + $0x30] sm:$0xff]  ;;  %v485_v6 = vld [vmem:[%s1339_s3 + $0x28] sm:$0xff] }
  0x18   :  { %875 = vmatprep.subr.mxu1 %v272_v18  ;;  %816 = vmatpush3.msra.mxu0 %v65_v25  ;;  %v53_v4 = vld [vmem:[%s1338_s2 + $0x50] sm:$0xff]  ;;  %v54_v5 = vld [vmem:[%s1338_s2 + $0x58] sm:$0xff]  ;;  %v484_v7 = vld [vmem:[%s1339_s3 + $0x20] sm:$0xff] }
  0x19   :  { %876 = vmatpush3.msra.mxu1 %v272_v18  ;;  %817 = vmatprep.subr.mxu0 %v64_v27  ;;  %v55_v8 = vld [vmem:[%s1338_s2 + $0x60] sm:$0xff]  ;;  %v56_v9 = vld [vmem:[%s1338_s2 + $0x68] sm:$0xff]  ;;  %v483_v10 = vld [vmem:[%s1339_s3 + $0x18] sm:$0xff] }
  0x1a   :  { %877 = vmatprep.subr.mxu1 %v271_v20  ;;  %818 = vmatpush3.msra.mxu0 %v64_v27  ;;  %v482_v11 = vld [vmem:[%s1339_s3 + $0x10] sm:$0xff]  ;;  %v58_v13 = vld [vmem:[%s1338_s2 + $0x78] sm:$0xff]  ;;  %v481_v14 = vld [vmem:[%s1339_s3 + $0x8] sm:$0xff] }
  0x1b   :  { %878 = vmatpush3.msra.mxu1 %v271_v20  ;;  %819 = vmatprep.subr.mxu0 %v63_v29  ;;  %v57_v12 = vld [vmem:[%s1338_s2 + $0x70] sm:$0xff]  ;;  %v480_v15 = vld [vmem:[%s1339_s3] sm:$0xff] }
  0x1c   :  { %879 = vmatprep.subr.mxu1 %v270_v22  ;;  %820 = vmatpush3.msra.mxu0 %v63_v29 }
  0x1d   :  { %880 = vmatpush3.msra.mxu1 %v270_v22  ;;  %821 = vmatprep.subr.mxu0 %v62_v31 }
  0x1e   :  { %881 = vmatprep.subr.mxu1 %v269_v24  ;;  %829 = vmatprep.mubr.f32.mxu0 %v43_v32 }
  0x1f   :  { %882 = vmatpush3.msra.mxu1 %v269_v24  ;;  %822 = vmatpush3.msra.mxu0 %v62_v31 }
  0x20   :  { %883 = vmatprep.subr.mxu1 %v268_v26  ;;  %823 = vmatprep.subr.mxu0 %v61_v34 }
  0x21   :  { %884 = vmatpush3.msra.mxu1 %v268_v26  ;;  %824 = vmatpush3.msra.mxu0 %v61_v34 }
  0x22   :  { %886 = vmatmul.mubr.f32.vlgmr.msra.gmra.mxu1 %v253_v28  ;;  %965 = vmatprep.subr.mxu1 %v495_v36 }
  0x23   :  { %888 = vmatprep.mubr.f32.mxu1 %v254_v30  ;;  %825 = vmatprep.subr.mxu0 %v60_v37 }
  0x24   :  { %981 = vmatpush3.msra.mxu1 %v495_v36  ;;  %826 = vmatpush3.msra.mxu0 %v60_v37 }
  0x25   :  { %966 = vmatprep.subr.mxu1 %v1158_v41  ;;  %827 = vmatprep.subr.mxu0 %v59_v39 }
  0x26   :  { %889 = vmatmul.mubr.f32.gmra.mxu1 %v255_v33  ;;  %828 = vmatpush3.msra.mxu0 %v59_v39 }
  0x27   :  { %891 = vmatprep.mubr.f32.mxu1 %v256_v35  ;;  %830 = vmatmul.mubr.f32.vlgmr.msra.gmra.mxu0 %v44_v42 }
  0x28   :  { %909 = vmatprep.subr.mxu0 %v495_v36  ;;  %832 = vmatprep.mubr.f32.mxu0 %v45_v43 }
  0x29   :  { %910 = vmatpush3.msra.mxu0 %v495_v36  ;;  %982 = vmatpush3.msra.mxu1 %v1158_v41 }
  0x2a   :  { %892 = vmatmul.mubr.f32.gmra.mxu1 %v257_v38  ;;  %911 = vmatprep.subr.mxu0 %v1158_v41 }
  0x2b   :  { %894 = vmatprep.mubr.f32.mxu1 %v258_v40  ;;  %912 = vmatpush3.msra.mxu0 %v1158_v41 }
  0x2c   :  { %833 = vmatmul.mubr.f32.gmra.mxu0 %v46_v46  ;;  %913 = vmatprep.subr.mxu0 %v493_v47 }
  0x2d   :  { %914 = vmatpush3.msra.mxu0 %v493_v47  ;;  %835 = vmatprep.mubr.f32.mxu0 %v47_v48  ;;  %v700_v48 = vld [vmem:[%s1340_s4] ss:$0 sm:$0xff] }
  0x2e   :  { %895 = vmatmul.mubr.f32.gmra.mxu1 %v259_v44  ;;  %915 = vmatprep.subr.mxu0 %v492_v50 }
  0x2f   :  { %897 = vmatprep.mubr.f32.mxu1 %v260_v45  ;;  %916 = vmatpush3.msra.mxu0 %v492_v50 }
  0x30   :  { %836 = vmatmul.mubr.f32.gmra.mxu0 %v48_v52  ;;  %917 = vmatprep.subr.mxu0 %v491_v53 }
  0x31   :  { %918 = vmatpush3.msra.mxu0 %v491_v53  ;;  %838 = vmatprep.mubr.f32.mxu0 %v49_v54 }
  0x32   :  { %898 = vmatmul.mubr.f32.gmra.mxu1 %v261_v49  ;;  %919 = vmatprep.subr.mxu0 %v490_v56 }
  0x33   :  { %900 = vmatprep.mubr.f32.mxu1 %v262_v51  ;;  %920 = vmatpush3.msra.mxu0 %v490_v56 }
  0x34   :  { %839 = vmatmul.mubr.f32.gmra.mxu0 %v50_v58  ;;  %921 = vmatprep.subr.mxu0 %v489_v59 }
  0x35   :  { %922 = vmatpush3.msra.mxu0 %v489_v59  ;;  %841 = vmatprep.mubr.f32.mxu0 %v51_v60 }
  0x36   :  { %901 = vmatmul.mubr.f32.gmra.mxu1 %v263_v55  ;;  %923 = vmatprep.subr.mxu0 %v488_v62 }
  0x37   :  { %903 = vmatprep.mubr.f32.mxu1 %v264_v57  ;;  %924 = vmatpush3.msra.mxu0 %v488_v62 }
  0x38   :  { %842 = vmatmul.mubr.f32.gmra.mxu0 %v52_v0  ;;  %925 = vmatprep.subr.mxu0 %v487_v1 }
  0x39   :  { %926 = vmatpush3.msra.mxu0 %v487_v1  ;;  %844 = vmatprep.mubr.f32.mxu0 %v53_v4 }
  0x3a   :  { %904 = vmatmul.mubr.f32.gmra.mxu1 %v265_v61  ;;  %927 = vmatprep.subr.mxu0 %v486_v3 }
  0x3b   :  { %906 = vmatprep.mubr.f32.mxu1 %v266_v63  ;;  %967 = vmatprep.subr.mxu1 %v493_v47 }
  0x3c   :  { %928 = vmatpush3.msra.mxu0 %v486_v3  ;;  %983 = vmatpush3.msra.mxu1 %v493_v47 }
  0x3d   :  { %845 = vmatmul.mubr.f32.gmra.mxu0 %v54_v5  ;;  %929 = vmatprep.subr.mxu0 %v485_v6 }
  0x3e   :  { %907 = vmatmul.mubr.f32.gmra.mxu1 %v267_v2  ;;  %968 = vmatprep.subr.mxu1 %v492_v50 }
  0x3f   :  { %930 = vmatpush3.msra.mxu0 %v485_v6  ;;  %984 = vmatpush3.msra.mxu1 %v492_v50 }
  0x40   :  { %931 = vmatprep.subr.mxu0 %v484_v7  ;;  %847 = vmatprep.mubr.f32.mxu0 %v55_v8 }
  0x41   :  { %969 = vmatprep.subr.mxu1 %v491_v53  ;;  %932 = vmatpush3.msra.mxu0 %v484_v7 }
  0x42   :  { %985 = vmatpush3.msra.mxu1 %v491_v53  ;;  %848 = vmatmul.mubr.f32.gmra.mxu0 %v56_v9 }
  0x43   :  { %933 = vmatprep.subr.mxu0 %v483_v10  ;;  %970 = vmatprep.subr.mxu1 %v490_v56 }
  0x44   :  { %934 = vmatpush3.msra.mxu0 %v483_v10  ;;  %986 = vmatpush3.msra.mxu1 %v490_v56 }
  0x45   :  { %935 = vmatprep.subr.mxu0 %v482_v11  ;;  %850 = vmatprep.mubr.f32.mxu0 %v57_v12 }
  0x46   :  { %971 = vmatprep.subr.mxu1 %v489_v59  ;;  %936 = vmatpush3.msra.mxu0 %v482_v11 }
  0x47   :  { %987 = vmatpush3.msra.mxu1 %v489_v59  ;;  %851 = vmatmul.mubr.f32.gmra.mxu0 %v58_v13 }
  0x48   :  { %972 = vmatprep.subr.mxu1 %v488_v62  ;;  %937 = vmatprep.subr.mxu0 %v481_v14 }
  0x49   :  { %988 = vmatpush3.msra.mxu1 %v488_v62  ;;  %938 = vmatpush3.msra.mxu0 %v481_v14 }
  0x4a   :  { %973 = vmatprep.subr.mxu1 %v487_v1  ;;  %939 = vmatprep.subr.mxu0 %v480_v15 }
  0x4b   :  { %989 = vmatpush3.msra.mxu1 %v487_v1  ;;  %940 = vmatpush3.msra.mxu0 %v480_v15 }
  0x4c   :  { %974 = vmatprep.subr.mxu1 %v486_v3 }
  0x4d   :  { %990 = vmatpush3.msra.mxu1 %v486_v3 }
  0x4e   :  { %975 = vmatprep.subr.mxu1 %v485_v6 }
  0x4f   :  { %991 = vmatpush3.msra.mxu1 %v485_v6 }
  0x50   :  { %976 = vmatprep.subr.mxu1 %v484_v7 }
  0x51   :  { %992 = vmatpush3.msra.mxu1 %v484_v7 }
  0x52   :  { %977 = vmatprep.subr.mxu1 %v483_v10 }
  0x53   :  { %993 = vmatpush3.msra.mxu1 %v483_v10 }
  0x54   :  { %978 = vmatprep.subr.mxu1 %v482_v11 }
  0x55   :  { %994 = vmatpush3.msra.mxu1 %v482_v11 }
  0x56   :  { %979 = vmatprep.subr.mxu1 %v481_v14 }
  0x57   :  { %995 = vmatpush3.msra.mxu1 %v481_v14 }
  0x58   :  { %980 = vmatprep.subr.mxu1 %v480_v15 }
  0x59   :  { %996 = vmatpush3.msra.mxu1 %v480_v15 }
  0xe2   :  { %v887_v16 = vpop.f32.mrf.mxu1 }
  0xe4   :  { %v350_v17 = vpop.f32.mrf.mxu1 }
  0xe5   :  { %941 = vmatprep.mubr.f32.mxu0 %v350_v17 }
  0xe6   :  { %v890_v18 = vpop.f32.mrf.mxu1  ;;  %942 = vmatmul.mubr.f32.vlgmr.msra.gmra.mxu0 %v887_v16 }
  0xe7   :  { %v831_v32 = vpop.f32.mrf.mxu0 }
  0xe8   :  { %v360_v19 = vpop.f32.mrf.mxu1 }
  0xe9   :  { %944 = vmatprep.mubr.f32.mxu0 %v360_v19  ;;  %v141_v33 = vpop.f32.mrf.mxu0 }
  0xea   :  { %v893_v20 = vpop.f32.mrf.mxu1  ;;  %945 = vmatmul.mubr.f32.gmra.mxu0 %v890_v18 }
  0xec   :  { %v370_v21 = vpop.f32.mrf.mxu1  ;;  %v834_v34 = vpop.f32.mrf.mxu0 }
  0xed   :  { %947 = vmatprep.mubr.f32.mxu0 %v370_v21 }
  0xee   :  { %v896_v22 = vpop.f32.mrf.mxu1  ;;  %948 = vmatmul.mubr.f32.gmra.mxu0 %v893_v20  ;;  %v151_v35 = vpop.f32.mrf.mxu0 }
  0xf0   :  { %v380_v23 = vpop.f32.mrf.mxu1  ;;  %v837_v36 = vpop.f32.mrf.mxu0 }
  0xf1   :  { %950 = vmatprep.mubr.f32.mxu0 %v380_v23 }
  0xf2   :  { %v899_v24 = vpop.f32.mrf.mxu1  ;;  %951 = vmatmul.mubr.f32.gmra.mxu0 %v896_v22  ;;  %v161_v37 = vpop.f32.mrf.mxu0 }
  0xf4   :  { %v390_v25 = vpop.f32.mrf.mxu1  ;;  %v840_v38 = vpop.f32.mrf.mxu0 }
  0xf5   :  { %953 = vmatprep.mubr.f32.mxu1 %v390_v25 }
  0xf6   :  { %v902_v26 = vpop.f32.mrf.mxu1  ;;  %954 = vmatmul.mubr.f32.vlgmr.msra.gmra.mxu1 %v899_v24  ;;  %v171_v39 = vpop.f32.mrf.mxu0 }
  0xf8   :  { %v400_v27 = vpop.f32.mrf.mxu1  ;;  %v843_v40 = vpop.f32.mrf.mxu0 }
  0xf9   :  { %956 = vmatprep.mubr.f32.mxu1 %v400_v27 }
  0xfa   :  { %v905_v28 = vpop.f32.mrf.mxu1  ;;  %957 = vmatmul.mubr.f32.gmra.mxu1 %v902_v26  ;;  %v181_v41 = vpop.f32.mrf.mxu0 }
  0xfc   :  { %v410_v29 = vpop.f32.mrf.mxu1 }
  0xfd   :  { %959 = vmatprep.mubr.f32.mxu1 %v410_v29  ;;  %v846_v42 = vpop.f32.mrf.mxu0 }
  0xfe   :  { %v908_v30 = vpop.f32.mrf.mxu1  ;;  %960 = vmatmul.mubr.f32.gmra.mxu1 %v905_v28 }
  0xff   :  { %v191_v43 = vpop.f32.mrf.mxu0 }
 0x100   :  { %v420_v31 = vpop.f32.mrf.mxu1 }
 0x101   :  { %962 = vmatprep.mubr.f32.mxu1 %v420_v31 }
 0x102   :  { %963 = vmatmul.mubr.f32.gmra.mxu1 %v908_v30  ;;  %v849_v44 = vpop.f32.mrf.mxu0 }
 0x104   :  { %v201_v45 = vpop.f32.mrf.mxu0 }
 0x107   :  { %v1278_v46 = vpop.f32.mrf.mxu0 }
 0x109   :  { %v1280_v47 = vpop.f32.mrf.mxu0 }
 0x1a6   :  { %v943_v49 = vpop.f32.mrf.mxu0 }
 0x1a7   :  { %v575_v50 = vadd.f32 %v943_v49, %v700_v48 }
 0x1a8   :  { %v569_v51 = vpop.f32.mrf.mxu0 }
 0x1a9   :  { %v665_v52 = vadd.f32 %v831_v32, %v575_v50  ;;  %v570_v53 = vadd.f32 %v700_v48, %v569_v51 }
 0x1aa   :  { %v946_v54 = vpop.f32.mrf.mxu0 }
 0x1ab   :  { %681 = vst [vmem:[%s1341_s6 + $0x8] sm:$0xff] %v665_v52  ;;  %v664_v55 = vadd.f32 %v570_v53, %v141_v33  ;;  %v585_v56 = vadd.f32 %v946_v54, %v700_v48 }
 0x1ac   :  { %v579_v57 = vpop.f32.mrf.mxu0 }
 0x1ad   :  { %680 = vst [vmem:[%s1341_s6] sm:$0xff] %v664_v55  ;;  %v667_v58 = vadd.f32 %v834_v34, %v585_v56  ;;  %v580_v59 = vadd.f32 %v700_v48, %v579_v57 }
 0x1ae   :  { %v949_v60 = vpop.f32.mrf.mxu0 }
 0x1af   :  { %683 = vst [vmem:[%s1341_s6 + $0x18] sm:$0xff] %v667_v58  ;;  %v666_v61 = vadd.f32 %v580_v59, %v151_v35  ;;  %v595_v62 = vadd.f32 %v949_v60, %v700_v48 }
 0x1b0   :  { %v589_v63 = vpop.f32.mrf.mxu0 }
 0x1b1   :  { %682 = vst [vmem:[%s1341_s6 + $0x10] sm:$0xff] %v666_v61  ;;  %v669_v0 = vadd.f32 %v837_v36, %v595_v62  ;;  %v590_v1 = vadd.f32 %v700_v48, %v589_v63 }
 0x1b2   :  { %v952_v2 = vpop.f32.mrf.mxu0 }
 0x1b3   :  { %685 = vst [vmem:[%s1341_s6 + $0x28] sm:$0xff] %v669_v0  ;;  %v668_v3 = vadd.f32 %v590_v1, %v161_v37  ;;  %v605_v4 = vadd.f32 %v952_v2, %v700_v48 }
 0x1b4   :  { %v599_v5 = vpop.f32.mrf.mxu0 }
 0x1b5   :  { %684 = vst [vmem:[%s1341_s6 + $0x20] sm:$0xff] %v668_v3  ;;  %v671_v6 = vadd.f32 %v840_v38, %v605_v4  ;;  %v600_v7 = vadd.f32 %v700_v48, %v599_v5 }
 0x1b6   :  { %v955_v8 = vpop.f32.mrf.mxu1 }
 0x1b7   :  { %687 = vst [vmem:[%s1341_s6 + $0x38] sm:$0xff] %v671_v6  ;;  %v670_v9 = vadd.f32 %v600_v7, %v171_v39  ;;  %v615_v10 = vadd.f32 %v955_v8, %v700_v48 }
 0x1b8   :  { %v609_v11 = vpop.f32.mrf.mxu1 }
 0x1b9   :  { %686 = vst [vmem:[%s1341_s6 + $0x30] sm:$0xff] %v670_v9  ;;  %v673_v12 = vadd.f32 %v843_v40, %v615_v10  ;;  %v610_v13 = vadd.f32 %v700_v48, %v609_v11 }
 0x1ba   :  { %v958_v14 = vpop.f32.mrf.mxu1 }
 0x1bb   :  { %689 = vst [vmem:[%s1341_s6 + $0x48] sm:$0xff] %v673_v12  ;;  %v672_v15 = vadd.f32 %v610_v13, %v181_v41  ;;  %v625_v16 = vadd.f32 %v958_v14, %v700_v48 }
 0x1bc   :  { %v619_v17 = vpop.f32.mrf.mxu1 }
 0x1bd   :  { %688 = vst [vmem:[%s1341_s6 + $0x40] sm:$0xff] %v672_v15  ;;  %v675_v18 = vadd.f32 %v846_v42, %v625_v16  ;;  %v620_v19 = vadd.f32 %v700_v48, %v619_v17 }
 0x1be   :  { %v961_v20 = vpop.f32.mrf.mxu1 }
 0x1bf   :  { %691 = vst [vmem:[%s1341_s6 + $0x58] sm:$0xff] %v675_v18  ;;  %v674_v21 = vadd.f32 %v620_v19, %v191_v43  ;;  %v635_v22 = vadd.f32 %v961_v20, %v700_v48 }
 0x1c0   :  { %v629_v23 = vpop.f32.mrf.mxu1 }
 0x1c1   :  { %690 = vst [vmem:[%s1341_s6 + $0x50] sm:$0xff] %v674_v21  ;;  %v677_v24 = vadd.f32 %v849_v44, %v635_v22  ;;  %v630_v25 = vadd.f32 %v700_v48, %v629_v23 }
 0x1c2   :  { %v964_v26 = vpop.f32.mrf.mxu1 }
 0x1c3   :  { %693 = vst [vmem:[%s1341_s6 + $0x68] sm:$0xff] %v677_v24  ;;  %v676_v27 = vadd.f32 %v630_v25, %v201_v45  ;;  %v645_v28 = vadd.f32 %v964_v26, %v700_v48 }
 0x1c4   :  { %v639_v29 = vpop.f32.mrf.mxu1 }
 0x1c5   :  { %692 = vst [vmem:[%s1341_s6 + $0x60] sm:$0xff] %v676_v27  ;;  %v679_v30 = vadd.f32 %v1278_v46, %v645_v28  ;;  %v640_v31 = vadd.f32 %v700_v48, %v639_v29 }
 0x1c7   :  { %695 = vst [vmem:[%s1341_s6 + $0x78] sm:$0xff] %v679_v30  ;;  %v678_v32 = vadd.f32 %v640_v31, %v1280_v47 }
 0x1c9   :  { %694 = vst [vmem:[%s1341_s6 + $0x70] sm:$0xff] %v678_v32 }

// kernel: graphsage_link_predictor.3
= control target key start
LH: loop header
LB: loop body
LE: loop exit
PB: predicated region body
PF: predicated region fallthrough
CT: control target
= control target key end

     0   :  { %s1378_s0 = inlined_call_operand.vmem [shape: f32[128,128], index: 0, kind: input, shape index: {}, may-alias: {0,2}]   ;;  %s1379_s1 = inlined_call_operand.vmem [shape: f32[128,128], index: 1, kind: input, shape index: {}]   ;;  %s1380_s5 = inlined_call_operand.vmem [shape: f32[128,128], index: 5, kind: input, shape index: {}]   ;;  %s1381_s2 = inlined_call_operand.vmem [shape: f32[128,128], index: 2, kind: input, shape index: {}, may-alias: {0,2}]   ;;  %s1382_s3 = inlined_call_operand.vmem [shape: f32[128,128], index: 3, kind: input, shape index: {}]   ;;  %s1383_s4 = inlined_call_operand.vmem [shape: f32[1,128], index: 4, kind: input, shape index: {}]   ;;  %s1384_s6 = inlined_call_operand.vmem [shape: f32[128,128], index: 6, kind: output, shape index: {}]  }
   0x1   :  { %v283_v0 = vld [vmem:[%s1378_s0 + $0x78] sm:$0xff]  ;;  %v282_v1 = vld [vmem:[%s1378_s0 + $0x70] sm:$0xff]  ;;  %v281_v2 = vld [vmem:[%s1378_s0 + $0x68] sm:$0xff] }
   0x2   :  { %869 = vmatprep.subr.mxu1 %v283_v0  ;;  %v280_v3 = vld [vmem:[%s1378_s0 + $0x60] sm:$0xff]  ;;  %v279_v5 = vld [vmem:[%s1378_s0 + $0x58] sm:$0xff]  ;;  %v278_v6 = vld [vmem:[%s1378_s0 + $0x50] sm:$0xff] }
   0x3   :  { %870 = vmatpush3.msra.mxu1 %v283_v0  ;;  %v252_v4 = vld [vmem:[%s1379_s1] sm:$0xff]  ;;  %v277_v7 = vld [vmem:[%s1378_s0 + $0x48] sm:$0xff]  ;;  %v74_v8 = vld [vmem:[%s1380_s5 + $0x78] sm:$0xff] }
   0x4   :  { %871 = vmatprep.subr.mxu1 %v282_v1  ;;  %901 = vmatprep.mubr.f32.mxu1 %v252_v4  ;;  %v73_v9 = vld [vmem:[%s1380_s5 + $0x70] sm:$0xff]  ;;  %v276_v10 = vld [vmem:[%s1378_s0 + $0x40] sm:$0xff]  ;;  %v72_v11 = vld [vmem:[%s1380_s5 + $0x68] sm:$0xff] }
   0x5   :  { %872 = vmatpush3.msra.mxu1 %v282_v1  ;;  %813 = vmatprep.subr.mxu0 %v74_v8  ;;  %v275_v12 = vld [vmem:[%s1378_s0 + $0x38] sm:$0xff]  ;;  %v71_v13 = vld [vmem:[%s1380_s5 + $0x60] sm:$0xff]  ;;  %v274_v14 = vld [vmem:[%s1378_s0 + $0x30] sm:$0xff] }
   0x6   :  { %873 = vmatprep.subr.mxu1 %v281_v2  ;;  %814 = vmatpush3.msra.mxu0 %v74_v8  ;;  %v70_v15 = vld [vmem:[%s1380_s5 + $0x58] sm:$0xff]  ;;  %v273_v16 = vld [vmem:[%s1378_s0 + $0x28] sm:$0xff]  ;;  %v69_v17 = vld [vmem:[%s1380_s5 + $0x50] sm:$0xff] }
   0x7   :  { %874 = vmatpush3.msra.mxu1 %v281_v2  ;;  %815 = vmatprep.subr.mxu0 %v73_v9  ;;  %v272_v18 = vld [vmem:[%s1378_s0 + $0x20] sm:$0xff]  ;;  %v68_v19 = vld [vmem:[%s1380_s5 + $0x48] sm:$0xff]  ;;  %v271_v20 = vld [vmem:[%s1378_s0 + $0x18] sm:$0xff] }
   0x8   :  { %875 = vmatprep.subr.mxu1 %v280_v3  ;;  %816 = vmatpush3.msra.mxu0 %v73_v9  ;;  %v67_v21 = vld [vmem:[%s1380_s5 + $0x40] sm:$0xff]  ;;  %v270_v22 = vld [vmem:[%s1378_s0 + $0x10] sm:$0xff]  ;;  %v66_v23 = vld [vmem:[%s1380_s5 + $0x38] sm:$0xff] }
   0x9   :  { %876 = vmatpush3.msra.mxu1 %v280_v3  ;;  %817 = vmatprep.subr.mxu0 %v72_v11  ;;  %v269_v24 = vld [vmem:[%s1378_s0 + $0x8] sm:$0xff]  ;;  %v65_v25 = vld [vmem:[%s1380_s5 + $0x30] sm:$0xff]  ;;  %v268_v26 = vld [vmem:[%s1378_s0] sm:$0xff] }
   0xa   :  { %877 = vmatprep.subr.mxu1 %v279_v5  ;;  %818 = vmatpush3.msra.mxu0 %v72_v11  ;;  %v64_v27 = vld [vmem:[%s1380_s5 + $0x28] sm:$0xff]  ;;  %v63_v29 = vld [vmem:[%s1380_s5 + $0x20] sm:$0xff]  ;;  %v254_v30 = vld [vmem:[%s1379_s1 + $0x10] sm:$0xff] }
   0xb   :  { %878 = vmatpush3.msra.mxu1 %v279_v5  ;;  %819 = vmatprep.subr.mxu0 %v71_v13  ;;  %v253_v28 = vld [vmem:[%s1379_s1 + $0x8] sm:$0xff]  ;;  %v62_v31 = vld [vmem:[%s1380_s5 + $0x18] sm:$0xff]  ;;  %v43_v32 = vld [vmem:[%s1381_s2] sm:$0xff] }
   0xc   :  { %879 = vmatprep.subr.mxu1 %v278_v6  ;;  %820 = vmatpush3.msra.mxu0 %v71_v13  ;;  %v255_v33 = vld [vmem:[%s1379_s1 + $0x18] sm:$0xff]  ;;  %v61_v34 = vld [vmem:[%s1380_s5 + $0x10] sm:$0xff]  ;;  %v256_v35 = vld [vmem:[%s1379_s1 + $0x20] sm:$0xff] }
   0xd   :  { %880 = vmatpush3.msra.mxu1 %v278_v6  ;;  %821 = vmatprep.subr.mxu0 %v70_v15  ;;  %v495_v36 = vld [vmem:[%s1382_s3 + $0x78] sm:$0xff]  ;;  %v60_v37 = vld [vmem:[%s1380_s5 + $0x8] sm:$0xff]  ;;  %v59_v39 = vld [vmem:[%s1380_s5] sm:$0xff] }
   0xe   :  { %881 = vmatprep.subr.mxu1 %v277_v7  ;;  %822 = vmatpush3.msra.mxu0 %v70_v15  ;;  %v257_v38 = vld [vmem:[%s1379_s1 + $0x28] sm:$0xff]  ;;  %v258_v40 = vld [vmem:[%s1379_s1 + $0x30] sm:$0xff]  ;;  %v259_v44 = vld [vmem:[%s1379_s1 + $0x38] sm:$0xff] }
   0xf   :  { %882 = vmatpush3.msra.mxu1 %v277_v7  ;;  %823 = vmatprep.subr.mxu0 %v69_v17  ;;  %v1174_v41 = vld [vmem:[%s1382_s3 + $0x70] sm:$0xff]  ;;  %v44_v42 = vld [vmem:[%s1381_s2 + $0x8] sm:$0xff]  ;;  %v260_v45 = vld [vmem:[%s1379_s1 + $0x40] sm:$0xff] }
  0x10   :  { %883 = vmatprep.subr.mxu1 %v276_v10  ;;  %824 = vmatpush3.msra.mxu0 %v69_v17  ;;  %v45_v43 = vld [vmem:[%s1381_s2 + $0x10] sm:$0xff]  ;;  %v46_v46 = vld [vmem:[%s1381_s2 + $0x18] sm:$0xff]  ;;  %v493_v47 = vld [vmem:[%s1382_s3 + $0x68] sm:$0xff] }
  0x11   :  { %884 = vmatpush3.msra.mxu1 %v276_v10  ;;  %825 = vmatprep.subr.mxu0 %v68_v19  ;;  %v47_v48 = vld [vmem:[%s1381_s2 + $0x20] sm:$0xff]  ;;  %v261_v49 = vld [vmem:[%s1379_s1 + $0x48] sm:$0xff]  ;;  %v262_v51 = vld [vmem:[%s1379_s1 + $0x50] sm:$0xff] }
  0x12   :  { %885 = vmatprep.subr.mxu1 %v275_v12  ;;  %826 = vmatpush3.msra.mxu0 %v68_v19  ;;  %v492_v50 = vld [vmem:[%s1382_s3 + $0x60] sm:$0xff]  ;;  %v48_v52 = vld [vmem:[%s1381_s2 + $0x28] sm:$0xff]  ;;  %v491_v53 = vld [vmem:[%s1382_s3 + $0x58] sm:$0xff] }
  0x13   :  { %886 = vmatpush3.msra.mxu1 %v275_v12  ;;  %827 = vmatprep.subr.mxu0 %v67_v21  ;;  %v49_v54 = vld [vmem:[%s1381_s2 + $0x30] sm:$0xff]  ;;  %v263_v55 = vld [vmem:[%s1379_s1 + $0x58] sm:$0xff]  ;;  %v264_v57 = vld [vmem:[%s1379_s1 + $0x60] sm:$0xff] }
  0x14   :  { %887 = vmatprep.subr.mxu1 %v274_v14  ;;  %828 = vmatpush3.msra.mxu0 %v67_v21  ;;  %v490_v56 = vld [vmem:[%s1382_s3 + $0x50] sm:$0xff]  ;;  %v50_v58 = vld [vmem:[%s1381_s2 + $0x38] sm:$0xff]  ;;  %v489_v59 = vld [vmem:[%s1382_s3 + $0x48] sm:$0xff] }
  0x15   :  { %888 = vmatpush3.msra.mxu1 %v274_v14  ;;  %829 = vmatprep.subr.mxu0 %v66_v23  ;;  %v51_v60 = vld [vmem:[%s1381_s2 + $0x40] sm:$0xff]  ;;  %v265_v61 = vld [vmem:[%s1379_s1 + $0x68] sm:$0xff]  ;;  %v266_v63 = vld [vmem:[%s1379_s1 + $0x70] sm:$0xff] }
  0x16   :  { %889 = vmatprep.subr.mxu1 %v273_v16  ;;  %830 = vmatpush3.msra.mxu0 %v66_v23  ;;  %v488_v62 = vld [vmem:[%s1382_s3 + $0x40] sm:$0xff]  ;;  %v52_v0 = vld [vmem:[%s1381_s2 + $0x48] sm:$0xff]  ;;  %v487_v1 = vld [vmem:[%s1382_s3 + $0x38] sm:$0xff] }
  0x17   :  { %890 = vmatpush3.msra.mxu1 %v273_v16  ;;  %831 = vmatprep.subr.mxu0 %v65_v25  ;;  %v267_v2 = vld [vmem:[%s1379_s1 + $0x78] sm:$0xff]  ;;  %v486_v3 = vld [vmem:[%s1382_s3 + $0x30] sm:$0xff]  ;;  %v485_v6 = vld [vmem:[%s1382_s3 + $0x28] sm:$0xff] }
  0x18   :  { %891 = vmatprep.subr.mxu1 %v272_v18  ;;  %832 = vmatpush3.msra.mxu0 %v65_v25  ;;  %v53_v4 = vld [vmem:[%s1381_s2 + $0x50] sm:$0xff]  ;;  %v54_v5 = vld [vmem:[%s1381_s2 + $0x58] sm:$0xff]  ;;  %v484_v7 = vld [vmem:[%s1382_s3 + $0x20] sm:$0xff] }
  0x19   :  { %892 = vmatpush3.msra.mxu1 %v272_v18  ;;  %833 = vmatprep.subr.mxu0 %v64_v27  ;;  %v55_v8 = vld [vmem:[%s1381_s2 + $0x60] sm:$0xff]  ;;  %v56_v9 = vld [vmem:[%s1381_s2 + $0x68] sm:$0xff]  ;;  %v483_v10 = vld [vmem:[%s1382_s3 + $0x18] sm:$0xff] }
  0x1a   :  { %893 = vmatprep.subr.mxu1 %v271_v20  ;;  %834 = vmatpush3.msra.mxu0 %v64_v27  ;;  %v482_v11 = vld [vmem:[%s1382_s3 + $0x10] sm:$0xff]  ;;  %v58_v13 = vld [vmem:[%s1381_s2 + $0x78] sm:$0xff]  ;;  %v481_v14 = vld [vmem:[%s1382_s3 + $0x8] sm:$0xff] }
  0x1b   :  { %894 = vmatpush3.msra.mxu1 %v271_v20  ;;  %835 = vmatprep.subr.mxu0 %v63_v29  ;;  %v57_v12 = vld [vmem:[%s1381_s2 + $0x70] sm:$0xff]  ;;  %v480_v15 = vld [vmem:[%s1382_s3] sm:$0xff] }
  0x1c   :  { %895 = vmatprep.subr.mxu1 %v270_v22  ;;  %836 = vmatpush3.msra.mxu0 %v63_v29 }
  0x1d   :  { %896 = vmatpush3.msra.mxu1 %v270_v22  ;;  %837 = vmatprep.subr.mxu0 %v62_v31 }
  0x1e   :  { %897 = vmatprep.subr.mxu1 %v269_v24  ;;  %845 = vmatprep.mubr.f32.mxu0 %v43_v32 }
  0x1f   :  { %898 = vmatpush3.msra.mxu1 %v269_v24  ;;  %838 = vmatpush3.msra.mxu0 %v62_v31 }
  0x20   :  { %899 = vmatprep.subr.mxu1 %v268_v26  ;;  %839 = vmatprep.subr.mxu0 %v61_v34 }
  0x21   :  { %900 = vmatpush3.msra.mxu1 %v268_v26  ;;  %840 = vmatpush3.msra.mxu0 %v61_v34 }
  0x22   :  { %902 = vmatmul.mubr.f32.vlgmr.msra.gmra.mxu1 %v253_v28  ;;  %981 = vmatprep.subr.mxu1 %v495_v36 }
  0x23   :  { %904 = vmatprep.mubr.f32.mxu1 %v254_v30  ;;  %841 = vmatprep.subr.mxu0 %v60_v37 }
  0x24   :  { %997 = vmatpush3.msra.mxu1 %v495_v36  ;;  %842 = vmatpush3.msra.mxu0 %v60_v37 }
  0x25   :  { %982 = vmatprep.subr.mxu1 %v1174_v41  ;;  %843 = vmatprep.subr.mxu0 %v59_v39 }
  0x26   :  { %905 = vmatmul.mubr.f32.gmra.mxu1 %v255_v33  ;;  %844 = vmatpush3.msra.mxu0 %v59_v39 }
  0x27   :  { %907 = vmatprep.mubr.f32.mxu1 %v256_v35  ;;  %846 = vmatmul.mubr.f32.vlgmr.msra.gmra.mxu0 %v44_v42 }
  0x28   :  { %925 = vmatprep.subr.mxu0 %v495_v36  ;;  %848 = vmatprep.mubr.f32.mxu0 %v45_v43 }
  0x29   :  { %926 = vmatpush3.msra.mxu0 %v495_v36  ;;  %998 = vmatpush3.msra.mxu1 %v1174_v41 }
  0x2a   :  { %908 = vmatmul.mubr.f32.gmra.mxu1 %v257_v38  ;;  %927 = vmatprep.subr.mxu0 %v1174_v41 }
  0x2b   :  { %910 = vmatprep.mubr.f32.mxu1 %v258_v40  ;;  %928 = vmatpush3.msra.mxu0 %v1174_v41 }
  0x2c   :  { %849 = vmatmul.mubr.f32.gmra.mxu0 %v46_v46  ;;  %929 = vmatprep.subr.mxu0 %v493_v47 }
  0x2d   :  { %930 = vmatpush3.msra.mxu0 %v493_v47  ;;  %851 = vmatprep.mubr.f32.mxu0 %v47_v48  ;;  %v1307_v48 = vld [vmem:[%s1383_s4] ss:$0 sm:$0xff] }
  0x2e   :  { %911 = vmatmul.mubr.f32.gmra.mxu1 %v259_v44  ;;  %931 = vmatprep.subr.mxu0 %v492_v50 }
  0x2f   :  { %913 = vmatprep.mubr.f32.mxu1 %v260_v45  ;;  %932 = vmatpush3.msra.mxu0 %v492_v50 }
  0x30   :  { %852 = vmatmul.mubr.f32.gmra.mxu0 %v48_v52  ;;  %933 = vmatprep.subr.mxu0 %v491_v53 }
  0x31   :  { %934 = vmatpush3.msra.mxu0 %v491_v53  ;;  %854 = vmatprep.mubr.f32.mxu0 %v49_v54 }
  0x32   :  { %914 = vmatmul.mubr.f32.gmra.mxu1 %v261_v49  ;;  %935 = vmatprep.subr.mxu0 %v490_v56 }
  0x33   :  { %916 = vmatprep.mubr.f32.mxu1 %v262_v51  ;;  %936 = vmatpush3.msra.mxu0 %v490_v56 }
  0x34   :  { %855 = vmatmul.mubr.f32.gmra.mxu0 %v50_v58  ;;  %937 = vmatprep.subr.mxu0 %v489_v59 }
  0x35   :  { %938 = vmatpush3.msra.mxu0 %v489_v59  ;;  %857 = vmatprep.mubr.f32.mxu0 %v51_v60 }
  0x36   :  { %917 = vmatmul.mubr.f32.gmra.mxu1 %v263_v55  ;;  %939 = vmatprep.subr.mxu0 %v488_v62 }
  0x37   :  { %919 = vmatprep.mubr.f32.mxu1 %v264_v57  ;;  %940 = vmatpush3.msra.mxu0 %v488_v62 }
  0x38   :  { %858 = vmatmul.mubr.f32.gmra.mxu0 %v52_v0  ;;  %941 = vmatprep.subr.mxu0 %v487_v1 }
  0x39   :  { %942 = vmatpush3.msra.mxu0 %v487_v1  ;;  %860 = vmatprep.mubr.f32.mxu0 %v53_v4 }
  0x3a   :  { %920 = vmatmul.mubr.f32.gmra.mxu1 %v265_v61  ;;  %943 = vmatprep.subr.mxu0 %v486_v3 }
  0x3b   :  { %922 = vmatprep.mubr.f32.mxu1 %v266_v63  ;;  %983 = vmatprep.subr.mxu1 %v493_v47 }
  0x3c   :  { %944 = vmatpush3.msra.mxu0 %v486_v3  ;;  %999 = vmatpush3.msra.mxu1 %v493_v47 }
  0x3d   :  { %861 = vmatmul.mubr.f32.gmra.mxu0 %v54_v5  ;;  %945 = vmatprep.subr.mxu0 %v485_v6 }
  0x3e   :  { %923 = vmatmul.mubr.f32.gmra.mxu1 %v267_v2  ;;  %984 = vmatprep.subr.mxu1 %v492_v50 }
  0x3f   :  { %946 = vmatpush3.msra.mxu0 %v485_v6  ;;  %1000 = vmatpush3.msra.mxu1 %v492_v50 }
  0x40   :  { %947 = vmatprep.subr.mxu0 %v484_v7  ;;  %863 = vmatprep.mubr.f32.mxu0 %v55_v8 }
  0x41   :  { %985 = vmatprep.subr.mxu1 %v491_v53  ;;  %948 = vmatpush3.msra.mxu0 %v484_v7 }
  0x42   :  { %1001 = vmatpush3.msra.mxu1 %v491_v53  ;;  %864 = vmatmul.mubr.f32.gmra.mxu0 %v56_v9 }
  0x43   :  { %949 = vmatprep.subr.mxu0 %v483_v10  ;;  %986 = vmatprep.subr.mxu1 %v490_v56 }
  0x44   :  { %950 = vmatpush3.msra.mxu0 %v483_v10  ;;  %1002 = vmatpush3.msra.mxu1 %v490_v56 }
  0x45   :  { %951 = vmatprep.subr.mxu0 %v482_v11  ;;  %866 = vmatprep.mubr.f32.mxu0 %v57_v12 }
  0x46   :  { %987 = vmatprep.subr.mxu1 %v489_v59  ;;  %952 = vmatpush3.msra.mxu0 %v482_v11 }
  0x47   :  { %1003 = vmatpush3.msra.mxu1 %v489_v59  ;;  %867 = vmatmul.mubr.f32.gmra.mxu0 %v58_v13 }
  0x48   :  { %988 = vmatprep.subr.mxu1 %v488_v62  ;;  %953 = vmatprep.subr.mxu0 %v481_v14 }
  0x49   :  { %1004 = vmatpush3.msra.mxu1 %v488_v62  ;;  %954 = vmatpush3.msra.mxu0 %v481_v14 }
  0x4a   :  { %989 = vmatprep.subr.mxu1 %v487_v1  ;;  %955 = vmatprep.subr.mxu0 %v480_v15 }
  0x4b   :  { %1005 = vmatpush3.msra.mxu1 %v487_v1  ;;  %956 = vmatpush3.msra.mxu0 %v480_v15 }
  0x4c   :  { %990 = vmatprep.subr.mxu1 %v486_v3 }
  0x4d   :  { %1006 = vmatpush3.msra.mxu1 %v486_v3 }
  0x4e   :  { %991 = vmatprep.subr.mxu1 %v485_v6 }
  0x4f   :  { %1007 = vmatpush3.msra.mxu1 %v485_v6 }
  0x50   :  { %992 = vmatprep.subr.mxu1 %v484_v7 }
  0x51   :  { %1008 = vmatpush3.msra.mxu1 %v484_v7 }
  0x52   :  { %993 = vmatprep.subr.mxu1 %v483_v10 }
  0x53   :  { %1009 = vmatpush3.msra.mxu1 %v483_v10 }
  0x54   :  { %994 = vmatprep.subr.mxu1 %v482_v11 }
  0x55   :  { %1010 = vmatpush3.msra.mxu1 %v482_v11 }
  0x56   :  { %995 = vmatprep.subr.mxu1 %v481_v14 }
  0x57   :  { %1011 = vmatpush3.msra.mxu1 %v481_v14 }
  0x58   :  { %996 = vmatprep.subr.mxu1 %v480_v15 }
  0x59   :  { %1012 = vmatpush3.msra.mxu1 %v480_v15 }
  0xe2   :  { %v903_v16 = vpop.f32.mrf.mxu1 }
  0xe4   :  { %v350_v17 = vpop.f32.mrf.mxu1 }
  0xe5   :  { %957 = vmatprep.mubr.f32.mxu0 %v350_v17 }
  0xe6   :  { %v906_v18 = vpop.f32.mrf.mxu1  ;;  %958 = vmatmul.mubr.f32.vlgmr.msra.gmra.mxu0 %v903_v16 }
  0xe7   :  { %v847_v32 = vpop.f32.mrf.mxu0 }
  0xe8   :  { %v360_v19 = vpop.f32.mrf.mxu1 }
  0xe9   :  { %960 = vmatprep.mubr.f32.mxu0 %v360_v19  ;;  %v141_v33 = vpop.f32.mrf.mxu0 }
  0xea   :  { %v909_v20 = vpop.f32.mrf.mxu1  ;;  %961 = vmatmul.mubr.f32.gmra.mxu0 %v906_v18 }
  0xec   :  { %v370_v21 = vpop.f32.mrf.mxu1  ;;  %v850_v34 = vpop.f32.mrf.mxu0 }
  0xed   :  { %963 = vmatprep.mubr.f32.mxu0 %v370_v21 }
  0xee   :  { %v912_v22 = vpop.f32.mrf.mxu1  ;;  %964 = vmatmul.mubr.f32.gmra.mxu0 %v909_v20  ;;  %v151_v35 = vpop.f32.mrf.mxu0 }
  0xf0   :  { %v380_v23 = vpop.f32.mrf.mxu1  ;;  %v853_v36 = vpop.f32.mrf.mxu0 }
  0xf1   :  { %966 = vmatprep.mubr.f32.mxu0 %v380_v23 }
  0xf2   :  { %v915_v24 = vpop.f32.mrf.mxu1  ;;  %967 = vmatmul.mubr.f32.gmra.mxu0 %v912_v22  ;;  %v161_v37 = vpop.f32.mrf.mxu0 }
  0xf4   :  { %v390_v25 = vpop.f32.mrf.mxu1  ;;  %v856_v38 = vpop.f32.mrf.mxu0 }
  0xf5   :  { %969 = vmatprep.mubr.f32.mxu1 %v390_v25 }
  0xf6   :  { %v918_v26 = vpop.f32.mrf.mxu1  ;;  %970 = vmatmul.mubr.f32.vlgmr.msra.gmra.mxu1 %v915_v24  ;;  %v171_v39 = vpop.f32.mrf.mxu0 }
  0xf8   :  { %v400_v27 = vpop.f32.mrf.mxu1  ;;  %v859_v40 = vpop.f32.mrf.mxu0 }
  0xf9   :  { %972 = vmatprep.mubr.f32.mxu1 %v400_v27 }
  0xfa   :  { %v921_v28 = vpop.f32.mrf.mxu1  ;;  %973 = vmatmul.mubr.f32.gmra.mxu1 %v918_v26  ;;  %v181_v41 = vpop.f32.mrf.mxu0 }
  0xfc   :  { %v410_v29 = vpop.f32.mrf.mxu1 }
  0xfd   :  { %975 = vmatprep.mubr.f32.mxu1 %v410_v29  ;;  %v862_v42 = vpop.f32.mrf.mxu0 }
  0xfe   :  { %v924_v30 = vpop.f32.mrf.mxu1  ;;  %976 = vmatmul.mubr.f32.gmra.mxu1 %v921_v28 }
  0xff   :  { %v1294_v43 = vpop.f32.mrf.mxu0 }
 0x100   :  { %v420_v31 = vpop.f32.mrf.mxu1 }
 0x101   :  { %978 = vmatprep.mubr.f32.mxu1 %v420_v31 }
 0x102   :  { %979 = vmatmul.mubr.f32.gmra.mxu1 %v924_v30  ;;  %v1296_v44 = vpop.f32.mrf.mxu0 }
 0x104   :  { %v1298_v45 = vpop.f32.mrf.mxu0 }
 0x107   :  { %v1300_v46 = vpop.f32.mrf.mxu0 }
 0x109   :  { %v1302_v47 = vpop.f32.mrf.mxu0 }
 0x1a6   :  { %v959_v49 = vpop.f32.mrf.mxu0 }
 0x1a7   :  { %v575_v50 = vadd.f32 %v959_v49, %v1307_v48 }
 0x1a8   :  { %v569_v51 = vpop.f32.mrf.mxu0 }
 0x1a9   :  { %v665_v52 = vadd.f32 %v847_v32, %v575_v50  ;;  %v570_v53 = vadd.f32 %v1307_v48, %v569_v51 }
 0x1aa   :  { %v962_v54 = vpop.f32.mrf.mxu0 }
 0x1ab   :  { %v681_v55 = vmax.f32 %v665_v52, 0.0  ;;  %v664_v56 = vadd.f32 %v570_v53, %v141_v33  ;;  %v585_v57 = vadd.f32 %v962_v54, %v1307_v48 }
 0x1ac   :  { %v579_v58 = vpop.f32.mrf.mxu0 }
 0x1ad   :  { %697 = vst [vmem:[%s1384_s6 + $0x8] sm:$0xff] %v681_v55  ;;  %v680_v59 = vmax.f32 %v664_v56, 0.0  ;;  %v667_v60 = vadd.f32 %v850_v34, %v585_v57  ;;  %v580_v61 = vadd.f32 %v1307_v48, %v579_v58 }
 0x1ae   :  { %v965_v62 = vpop.f32.mrf.mxu0 }
 0x1af   :  { %696 = vst [vmem:[%s1384_s6] sm:$0xff] %v680_v59  ;;  %v683_v63 = vmax.f32 %v667_v60, 0.0  ;;  %v666_v0 = vadd.f32 %v580_v61, %v151_v35  ;;  %v595_v1 = vadd.f32 %v965_v62, %v1307_v48 }
 0x1b0   :  { %v589_v2 = vpop.f32.mrf.mxu0 }
 0x1b1   :  { %699 = vst [vmem:[%s1384_s6 + $0x18] sm:$0xff] %v683_v63  ;;  %v682_v3 = vmax.f32 %v666_v0, 0.0  ;;  %v669_v4 = vadd.f32 %v853_v36, %v595_v1  ;;  %v590_v5 = vadd.f32 %v1307_v48, %v589_v2 }
 0x1b2   :  { %v968_v6 = vpop.f32.mrf.mxu0 }
 0x1b3   :  { %698 = vst [vmem:[%s1384_s6 + $0x10] sm:$0xff] %v682_v3  ;;  %v685_v7 = vmax.f32 %v669_v4, 0.0  ;;  %v668_v8 = vadd.f32 %v590_v5, %v161_v37  ;;  %v605_v9 = vadd.f32 %v968_v6, %v1307_v48 }
 0x1b4   :  { %v599_v10 = vpop.f32.mrf.mxu0 }
 0x1b5   :  { %701 = vst [vmem:[%s1384_s6 + $0x28] sm:$0xff] %v685_v7  ;;  %v684_v11 = vmax.f32 %v668_v8, 0.0  ;;  %v671_v12 = vadd.f32 %v856_v38, %v605_v9  ;;  %v600_v13 = vadd.f32 %v1307_v48, %v599_v10 }
 0x1b6   :  { %v971_v14 = vpop.f32.mrf.mxu1 }
 0x1b7   :  { %700 = vst [vmem:[%s1384_s6 + $0x20] sm:$0xff] %v684_v11  ;;  %v687_v15 = vmax.f32 %v671_v12, 0.0  ;;  %v670_v16 = vadd.f32 %v600_v13, %v171_v39  ;;  %v615_v17 = vadd.f32 %v971_v14, %v1307_v48 }
 0x1b8   :  { %v609_v18 = vpop.f32.mrf.mxu1 }
 0x1b9   :  { %703 = vst [vmem:[%s1384_s6 + $0x38] sm:$0xff] %v687_v15  ;;  %v686_v19 = vmax.f32 %v670_v16, 0.0  ;;  %v673_v20 = vadd.f32 %v859_v40, %v615_v17  ;;  %v610_v21 = vadd.f32 %v1307_v48, %v609_v18 }
 0x1ba   :  { %v974_v22 = vpop.f32.mrf.mxu1 }
 0x1bb   :  { %702 = vst [vmem:[%s1384_s6 + $0x30] sm:$0xff] %v686_v19  ;;  %v689_v23 = vmax.f32 %v673_v20, 0.0  ;;  %v672_v24 = vadd.f32 %v610_v21, %v181_v41  ;;  %v625_v25 = vadd.f32 %v974_v22, %v1307_v48 }
 0x1bc   :  { %v619_v26 = vpop.f32.mrf.mxu1 }
 0x1bd   :  { %705 = vst [vmem:[%s1384_s6 + $0x48] sm:$0xff] %v689_v23  ;;  %v688_v27 = vmax.f32 %v672_v24, 0.0  ;;  %v675_v28 = vadd.f32 %v862_v42, %v625_v25  ;;  %v620_v29 = vadd.f32 %v1307_v48, %v619_v26 }
 0x1be   :  { %v977_v30 = vpop.f32.mrf.mxu1 }
 0x1bf   :  { %704 = vst [vmem:[%s1384_s6 + $0x40] sm:$0xff] %v688_v27  ;;  %v691_v31 = vmax.f32 %v675_v28, 0.0  ;;  %v674_v32 = vadd.f32 %v620_v29, %v1294_v43  ;;  %v635_v33 = vadd.f32 %v977_v30, %v1307_v48 }
 0x1c0   :  { %v629_v34 = vpop.f32.mrf.mxu1 }
 0x1c1   :  { %707 = vst [vmem:[%s1384_s6 + $0x58] sm:$0xff] %v691_v31  ;;  %v690_v35 = vmax.f32 %v674_v32, 0.0  ;;  %v677_v36 = vadd.f32 %v1296_v44, %v635_v33  ;;  %v630_v37 = vadd.f32 %v1307_v48, %v629_v34 }
 0x1c2   :  { %v980_v38 = vpop.f32.mrf.mxu1 }
 0x1c3   :  { %706 = vst [vmem:[%s1384_s6 + $0x50] sm:$0xff] %v690_v35  ;;  %v693_v39 = vmax.f32 %v677_v36, 0.0  ;;  %v676_v40 = vadd.f32 %v630_v37, %v1298_v45  ;;  %v645_v41 = vadd.f32 %v980_v38, %v1307_v48 }
 0x1c4   :  { %v639_v42 = vpop.f32.mrf.mxu1 }
 0x1c5   :  { %709 = vst [vmem:[%s1384_s6 + $0x68] sm:$0xff] %v693_v39  ;;  %v692_v43 = vmax.f32 %v676_v40, 0.0  ;;  %v679_v44 = vadd.f32 %v1300_v46, %v645_v41  ;;  %v640_v49 = vadd.f32 %v1307_v48, %v639_v42 }
 0x1c7   :  { %708 = vst [vmem:[%s1384_s6 + $0x60] sm:$0xff] %v692_v43  ;;  %v695_v50 = vmax.f32 %v679_v44, 0.0  ;;  %v678_v51 = vadd.f32 %v640_v49, %v1302_v47 }
 0x1c9   :  { %711 = vst [vmem:[%s1384_s6 + $0x78] sm:$0xff] %v695_v50  ;;  %v694_v45 = vmax.f32 %v678_v51, 0.0 }
 0x1cb   :  { %710 = vst [vmem:[%s1384_s6 + $0x70] sm:$0xff] %v694_v45 }

</bundles_post_ra>
